<compile_context>
chip_gen: v5e
topology: v5e:2x2
jax: 0.10.0
libtpu: 0.0.40
codegen_flags: <defaults>
</compile_context>

<pallas_src>
import functools
import math

import jax
import jax.numpy as jnp
import numpy as np
from jax.experimental import pallas as pl
from jax.experimental.pallas import tpu as pltpu

NUM_HEADS = 4


# ------------------------------ fused forward kernel ------------------------------
def _fused_kernel(x_ref, w1_ref, u1_ref, b1_ref, w2u2_ref, b2_ref,
                  wqkv_ref, bqkv_ref, wo_ref, bo_ref, wfc_ref, bfc_ref,
                  out_ref, *, num_heads, seq_len):
    T = seq_len
    TB, D = x_ref.shape                       # x is flat time-major rows: row = t*B + b
    B = TB // T
    H = u1_ref.shape[0]                       # u1: (H, 4H)
    hd = H // num_heads
    scale = 1.0 / math.sqrt(hd)

    u1 = u1_ref[...]
    w2u2 = w2u2_ref[...]
    # hoisted bias broadcasts (JAX does not CSE broadcast_in_dim inside the unroll)
    b2b = jnp.broadcast_to(b2_ref[...], (B, 4 * H))

    # ---- layer-1 input projection hoisted off the recurrence: one MXU op + one bias add
    xw1 = (jnp.dot(x_ref[...], w1_ref[...], preferred_element_type=jnp.float32)
           + b1_ref[...])                                         # (T*B, 4H)
    xw1_t = [xw1[t * B:(t + 1) * B, :] for t in range(T)]         # static slices, off-chain

    def gate_act(gates):
        # 2 full-vreg EUP passes instead of 4 quarter-width ones; PyTorch order i,f,g,o
        s = jax.nn.sigmoid(gates)                                  # (B, 4H)
        g = jnp.tanh(gates)                                        # (B, 4H)
        return s[:, 0:H], s[:, H:2 * H], g[:, 2 * H:3 * H], s[:, 3 * H:4 * H]

    # ---- fused 2-layer LSTM recurrence, statically unrolled over T ----
    h1 = jnp.zeros((B, H), jnp.float32)
    c1 = jnp.zeros((B, H), jnp.float32)
    h2 = jnp.zeros((B, H), jnp.float32)
    c2 = jnp.zeros((B, H), jnp.float32)
    h2_steps = []                              # stays in vregs; no scratch store
    for t in range(T):
        # layer 1: only the recurrent matmul remains on the serial chain
        gates1 = xw1_t[t] + jnp.dot(h1, u1, preferred_element_type=jnp.float32)
        i1, f1, g1, o1 = gate_act(gates1)
        c1 = f1 * c1 + i1 * g1
        h1 = o1 * jnp.tanh(c1)
        # layer 2: single fused [h1 | h2] @ [W2 ; U2] matmul
        gates2 = (jnp.dot(jnp.concatenate([h1, h2], axis=-1), w2u2,
                          preferred_element_type=jnp.float32) + b2b)
        i2, f2, g2, o2 = gate_act(gates2)
        c2 = f2 * c2 + i2 * g2
        h2 = o2 * jnp.tanh(c2)
        h2_steps.append(h2)

    # batch-major assembly (row = b*T + t) to match the PyTorch flatten order
    if B == 1:
        h2_all = jnp.concatenate(h2_steps, axis=0)                 # (T, H)
    else:
        h2_all = jnp.concatenate(
            [h2_steps[t][b:b + 1, :] for b in range(B) for t in range(T)],
            axis=0)                                                # (B*T, H)

    # ---- QKV projection once for all rows ----
    qkv = (jnp.dot(h2_all, wqkv_ref[...], preferred_element_type=jnp.float32)
           + bqkv_ref[...])                                        # (B*T, 3H)

    # ---- all (batch, head) score blocks, then ONE softmax over the stacked tile ----
    score_blocks = []
    for b in range(B):
        r0 = b * T
        for hh in range(num_heads):
            lo = hh * hd
            q = qkv[r0:r0 + T, lo:lo + hd]                         # (T, hd)
            k = qkv[r0:r0 + T, H + lo:H + lo + hd]                 # (T, hd)
            score_blocks.append(
                jnp.dot(q, k.T, preferred_element_type=jnp.float32) * scale)
    s_all = jnp.concatenate(score_blocks, axis=0)                  # (B*nh*T, T)
    m = jnp.max(s_all, axis=-1, keepdims=True)
    e = jnp.exp(s_all - m)
    p_all = e * pl.reciprocal(jnp.sum(e, axis=-1, keepdims=True), approx=True)

    # ---- PV per (batch, head); lane-concat heads; ONE output-projection matmul ----
    ctx_rows = []
    for b in range(B):
        r0 = b * T
        heads = []
        for hh in range(num_heads):
            idx = b * num_heads + hh
            lo = hh * hd
            p = p_all[idx * T:(idx + 1) * T, :]                    # (T, T)
            v = qkv[r0:r0 + T, 2 * H + lo:2 * H + lo + hd]         # (T, hd)
            heads.append(jnp.dot(p, v, preferred_element_type=jnp.float32))
        ctx_rows.append(jnp.concatenate(heads, axis=-1))           # (T, H)
    ctx = jnp.concatenate(ctx_rows, axis=0)                        # (B*T, H)
    attn_out = (jnp.dot(ctx, wo_ref[...], preferred_element_type=jnp.float32)
                + bo_ref[...])                                     # (B*T, H)

    # Dropout(p=0.3) is identity in eval/inference mode.
    mul = h2_all * attn_out                                        # fused attention_mul
    # fc over the flattened (t, h) layout: elementwise mul with wfc (T, H) + reduce
    wfc = wfc_ref[...]
    rows = []
    for b in range(B):
        rows.append(jnp.sum(mul[b * T:(b + 1) * T, :] * wfc, axis=0, keepdims=True))
    partial = jnp.concatenate(rows, axis=0) if B > 1 else rows[0]  # (B, H)
    out_ref[...] = jnp.sum(partial, axis=1, keepdims=True) + bfc_ref[...]   # (B, 1)


# ----------------------------------- wrapper --------------------------------------
def prepare_params(params):
    """One-time re-layout of the PyTorch-format weights for the fused kernel."""
    w_ih1, w_hh1, b_ih1, b_hh1 = params["lstm1"]
    w_ih2, w_hh2, b_ih2, b_hh2 = params["lstm2"]
    in_w, in_b, out_w, out_b = params["attn"]
    fc_w, fc_b = params["fc"]
    H = w_hh1.shape[1]
    w2 = jnp.transpose(w_ih2)
    u2 = jnp.transpose(w_hh2)
    return {
        "w1": jnp.transpose(w_ih1), "u1": jnp.transpose(w_hh1),
        "b1": (b_ih1 + b_hh1).reshape(1, 4 * H),
        "w2u2": jnp.concatenate([w2, u2], axis=0),      # (2H, 4H): fused [W2; U2]
        "b2": (b_ih2 + b_hh2).reshape(1, 4 * H),
        "wqkv": jnp.transpose(in_w), "bqkv": in_b.reshape(1, 3 * H),
        "wo": jnp.transpose(out_w), "bo": out_b.reshape(1, H),
        "wfc": fc_w.reshape(-1, H),                      # (T, H); flatten index = t*H + h
        "bfc": fc_b.reshape(1, 1),
    }


@jax.jit
def lstm_attention_forward(x, kp):
    B, T, D = x.shape
    # flat time-major rows (row = t*B + b) so the layer-1 projection is one matmul
    x_flat = jnp.transpose(x, (1, 0, 2)).reshape(T * B, D)

    operands = (x_flat, kp["w1"], kp["u1"], kp["b1"], kp["w2u2"], kp["b2"],
                kp["wqkv"], kp["bqkv"], kp["wo"], kp["bo"], kp["wfc"], kp["bfc"])

    def full_spec(shape):
        return pl.BlockSpec(shape, lambda i, _n=len(shape): (0,) * _n)

    kernel = functools.partial(_fused_kernel, num_heads=NUM_HEADS, seq_len=T)
    return pl.pallas_call(
        kernel,
        out_shape=jax.ShapeDtypeStruct((B, 1), jnp.float32),
        grid_spec=pltpu.PrefetchScalarGridSpec(
            num_scalar_prefetch=0,
            grid=(1,),                           # whole model fits in VMEM: single step
            in_specs=[full_spec(op.shape) for op in operands],
            out_specs=pl.BlockSpec((B, 1), lambda i: (0, 0)),
        ),
        compiler_params=pltpu.CompilerParams(
            dimension_semantics=("arbitrary",)),
    )(*operands)


# ------------------------- deterministic parameter init ---------------------------
def init_params(key, input_dim, hidden_dim, window_size):
    H = hidden_dim
    ks = list(jax.random.split(key, 16))

    def u(shape, bound):
        k = ks.pop()
        return jax.random.uniform(k, shape, jnp.float32, -bound, bound)

    bl = 1.0 / math.sqrt(H)
    lstm1 = (u((4 * H, input_dim), bl), u((4 * H, H), bl), u((4 * H,), bl), u((4 * H,), bl))
    lstm2 = (u((4 * H, H), bl), u((4 * H, H), bl), u((4 * H,), bl), u((4 * H,), bl))
    attn = (u((3 * H, H), bl), u((3 * H,), bl), u((H, H), bl), u((H,), bl))
    bf = 1.0 / math.sqrt(H * window_size)
    fcp = (u((1, H * window_size), bf), u((1,), bf))
    return {"lstm1": lstm1, "lstm2": lstm2, "attn": attn, "fc": fcp}


# ------------------------------ pure-JAX reference ---------------------------------
def _ref_lstm(x, w_ih, w_hh, b_ih, b_hh):
    B, T, D = x.shape
    H = w_hh.shape[1]

    def step(carry, x_t):
        h, c = carry
        gates = x_t @ w_ih.T + b_ih + h @ w_hh.T + b_hh
        i, f, g, o = jnp.split(gates, 4, axis=-1)
        c = jax.nn.sigmoid(f) * c + jax.nn.sigmoid(i) * jnp.tanh(g)
        h = jax.nn.sigmoid(o) * jnp.tanh(c)
        return (h, c), h

    init = (jnp.zeros((B, H)), jnp.zeros((B, H)))
    _, hs = jax.lax.scan(step, init, jnp.transpose(x, (1, 0, 2)))
    return jnp.transpose(hs, (1, 0, 2))


def _ref_mha(x, in_proj_w, in_proj_b, out_proj_w, out_proj_b, num_heads):
    B, T, H = x.shape
    hd = H // num_heads
    qkv = x @ in_proj_w.T + in_proj_b
    q, k, v = jnp.split(qkv, 3, axis=-1)
    q = q.reshape(B, T, num_heads, hd).transpose(0, 2, 1, 3)
    k = k.reshape(B, T, num_heads, hd).transpose(0, 2, 1, 3)
    v = v.reshape(B, T, num_heads, hd).transpose(0, 2, 1, 3)
    s = jnp.einsum("bhqd,bhkd->bhqk", q, k) / math.sqrt(hd)
    p = jax.nn.softmax(s, axis=-1)
    o = jnp.einsum("bhqk,bhkd->bhqd", p, v).transpose(0, 2, 1, 3).reshape(B, T, H)
    return o @ out_proj_w.T + out_proj_b


def reference_forward(x, params):
    h1 = _ref_lstm(x, *params["lstm1"])
    h2 = _ref_lstm(h1, *params["lstm2"])
    attn = _ref_mha(h2, *params["attn"], num_heads=NUM_HEADS)
    mul = h2 * attn
    flat = mul.reshape(mul.shape[0], -1)
    return flat @ params["fc"][0].T + params["fc"][1]


# --------------------------------------- main --------------------------------------
if __name__ == "__main__":
    B, T, D, H = 2, 8, 16, 32          # batch, window_size, input_dim, hidden_dim
    key = jax.random.PRNGKey(0)
    pkey, xkey = jax.random.split(key)
    params = init_params(pkey, D, H, T)
    x = jax.random.normal(xkey, (B, T, D), jnp.float32)

    kp = prepare_params(params)        # one-time weight re-layout (outside per-call path)
    out = jax.block_until_ready(lstm_attention_forward(x, kp))
    ref = reference_forward(x, params)

    assert out.shape == (B, 1), out.shape
    np.testing.assert_allclose(np.asarray(out), np.asarray(ref), rtol=1e-4, atol=1e-4)
    print("KERNEL_OK")
</pallas_src>

<mosaic_0001>
module attributes {stable_mosaic.version = 11 : i64} {
  func.func @_fused_kernel(%arg0: i32, %arg1: memref<16x16xf32, #tpu.memory_space<vmem>>, %arg2: memref<16x128xf32, #tpu.memory_space<vmem>>, %arg3: memref<32x128xf32, #tpu.memory_space<vmem>>, %arg4: memref<1x128xf32, #tpu.memory_space<vmem>>, %arg5: memref<64x128xf32, #tpu.memory_space<vmem>>, %arg6: memref<1x128xf32, #tpu.memory_space<vmem>>, %arg7: memref<32x96xf32, #tpu.memory_space<vmem>>, %arg8: memref<1x96xf32, #tpu.memory_space<vmem>>, %arg9: memref<32x32xf32, #tpu.memory_space<vmem>>, %arg10: memref<1x32xf32, #tpu.memory_space<vmem>>, %arg11: memref<8x32xf32, #tpu.memory_space<vmem>>, %arg12: memref<1x1xf32, #tpu.memory_space<vmem>>, %arg13: memref<2x1xf32, #tpu.memory_space<vmem>>) attributes {dimension_semantics = [#tpu.dimension_semantics<arbitrary>], iteration_bounds = array<i64: 1>, scalar_prefetch = 0 : i64, scratch_operands = 0 : i64, tpu.core_type = #tpu.core_type<tc>, window_params = [{pipeline_mode = #tpu.pipeline_mode<synchronous>, transform_indices = @transform_0, window_bounds = array<i64: 16, 16>}, {pipeline_mode = #tpu.pipeline_mode<synchronous>, transform_indices = @transform_1, window_bounds = array<i64: 16, 128>}, {pipeline_mode = #tpu.pipeline_mode<synchronous>, transform_indices = @transform_2, window_bounds = array<i64: 32, 128>}, {pipeline_mode = #tpu.pipeline_mode<synchronous>, transform_indices = @transform_3, window_bounds = array<i64: 1, 128>}, {pipeline_mode = #tpu.pipeline_mode<synchronous>, transform_indices = @transform_4, window_bounds = array<i64: 64, 128>}, {pipeline_mode = #tpu.pipeline_mode<synchronous>, transform_indices = @transform_5, window_bounds = array<i64: 1, 128>}, {pipeline_mode = #tpu.pipeline_mode<synchronous>, transform_indices = @transform_6, window_bounds = array<i64: 32, 96>}, {pipeline_mode = #tpu.pipeline_mode<synchronous>, transform_indices = @transform_7, window_bounds = array<i64: 1, 96>}, {pipeline_mode = #tpu.pipeline_mode<synchronous>, transform_indices = @transform_8, window_bounds = array<i64: 32, 32>}, {pipeline_mode = #tpu.pipeline_mode<synchronous>, transform_indices = @transform_9, window_bounds = array<i64: 1, 32>}, {pipeline_mode = #tpu.pipeline_mode<synchronous>, transform_indices = @transform_10, window_bounds = array<i64: 8, 32>}, {pipeline_mode = #tpu.pipeline_mode<synchronous>, transform_indices = @transform_11, window_bounds = array<i64: 1, 1>}, {pipeline_mode = #tpu.pipeline_mode<synchronous>, transform_indices = @transform_12, window_bounds = array<i64: 2, 1>}]} {
    %c0 = arith.constant 0 : index
    %c0_0 = arith.constant 0 : index
    %0 = vector.load %arg3[%c0, %c0_0] : memref<32x128xf32, #tpu.memory_space<vmem>>, vector<32x128xf32>
    %c0_1 = arith.constant 0 : index
    %c0_2 = arith.constant 0 : index
    %1 = vector.load %arg5[%c0_1, %c0_2] : memref<64x128xf32, #tpu.memory_space<vmem>>, vector<64x128xf32>
    %c0_3 = arith.constant 0 : index
    %c0_4 = arith.constant 0 : index
    %2 = vector.load %arg6[%c0_3, %c0_4] : memref<1x128xf32, #tpu.memory_space<vmem>>, vector<1x128xf32>
    %3 = vector.shape_cast %2 : vector<1x128xf32> to vector<1x128xf32>
    %4 = vector.broadcast %3 : vector<1x128xf32> to vector<2x128xf32>
    %c0_5 = arith.constant 0 : index
    %c0_6 = arith.constant 0 : index
    %5 = vector.load %arg1[%c0_5, %c0_6] : memref<16x16xf32, #tpu.memory_space<vmem>>, vector<16x16xf32>
    %c0_7 = arith.constant 0 : index
    %c0_8 = arith.constant 0 : index
    %6 = vector.load %arg2[%c0_7, %c0_8] : memref<16x128xf32, #tpu.memory_space<vmem>>, vector<16x128xf32>
    %cst = arith.constant dense<0.000000e+00> : vector<16x128xf32>
    %7 = tpu.matmul %5, %6, %cst {dimension_numbers = #tpu.dot_dimension_numbers<[1], [0], [0], [1], [0, 0, 1, 1], [], []>} : vector<16x16xf32>, vector<16x128xf32>, vector<16x128xf32> -> vector<16x128xf32>
    %c0_9 = arith.constant 0 : index
    %c0_10 = arith.constant 0 : index
    %8 = vector.load %arg4[%c0_9, %c0_10] : memref<1x128xf32, #tpu.memory_space<vmem>>, vector<1x128xf32>
    %9 = vector.broadcast %8 : vector<1x128xf32> to vector<16x128xf32>
    %10 = arith.addf %7, %9 : vector<16x128xf32>
    %11 = vector.extract_strided_slice %10 {offsets = [0, 0], sizes = [2, 128], strides = [1, 1]} : vector<16x128xf32> to vector<2x128xf32>
    %12 = vector.extract_strided_slice %10 {offsets = [2, 0], sizes = [2, 128], strides = [1, 1]} : vector<16x128xf32> to vector<2x128xf32>
    %13 = vector.extract_strided_slice %10 {offsets = [4, 0], sizes = [2, 128], strides = [1, 1]} : vector<16x128xf32> to vector<2x128xf32>
    %14 = vector.extract_strided_slice %10 {offsets = [6, 0], sizes = [2, 128], strides = [1, 1]} : vector<16x128xf32> to vector<2x128xf32>
    %15 = vector.extract_strided_slice %10 {offsets = [8, 0], sizes = [2, 128], strides = [1, 1]} : vector<16x128xf32> to vector<2x128xf32>
    %16 = vector.extract_strided_slice %10 {offsets = [10, 0], sizes = [2, 128], strides = [1, 1]} : vector<16x128xf32> to vector<2x128xf32>
    %17 = vector.extract_strided_slice %10 {offsets = [12, 0], sizes = [2, 128], strides = [1, 1]} : vector<16x128xf32> to vector<2x128xf32>
    %18 = vector.extract_strided_slice %10 {offsets = [14, 0], sizes = [2, 128], strides = [1, 1]} : vector<16x128xf32> to vector<2x128xf32>
    %cst_11 = arith.constant 0.000000e+00 : f32
    %19 = vector.broadcast %cst_11 : f32 to vector<2x32xf32>
    %cst_12 = arith.constant 0.000000e+00 : f32
    %20 = vector.broadcast %cst_12 : f32 to vector<2x32xf32>
    %cst_13 = arith.constant 0.000000e+00 : f32
    %21 = vector.broadcast %cst_13 : f32 to vector<2x32xf32>
    %cst_14 = arith.constant 0.000000e+00 : f32
    %22 = vector.broadcast %cst_14 : f32 to vector<2x32xf32>
    %cst_15 = arith.constant dense<0.000000e+00> : vector<2x128xf32>
    %23 = tpu.matmul %19, %0, %cst_15 {dimension_numbers = #tpu.dot_dimension_numbers<[1], [0], [0], [1], [0, 0, 1, 1], [], []>} : vector<2x32xf32>, vector<32x128xf32>, vector<2x128xf32> -> vector<2x128xf32>
    %24 = arith.addf %11, %23 : vector<2x128xf32>
    %25 = arith.negf %24 : vector<2x128xf32>
    %26 = math.exp %25 : vector<2x128xf32>
    %cst_16 = arith.constant 1.000000e+00 : f32
    %27 = vector.broadcast %cst_16 : f32 to vector<2x128xf32>
    %28 = arith.addf %27, %26 : vector<2x128xf32>
    %29 = arith.divf %27, %28 : vector<2x128xf32>
    %30 = math.tanh %24 : vector<2x128xf32>
    %31 = vector.extract_strided_slice %29 {offsets = [0, 0], sizes = [2, 32], strides = [1, 1]} : vector<2x128xf32> to vector<2x32xf32>
    %32 = vector.extract_strided_slice %29 {offsets = [0, 32], sizes = [2, 32], strides = [1, 1]} : vector<2x128xf32> to vector<2x32xf32>
    %33 = vector.extract_strided_slice %30 {offsets = [0, 64], sizes = [2, 32], strides = [1, 1]} : vector<2x128xf32> to vector<2x32xf32>
    %34 = vector.extract_strided_slice %29 {offsets = [0, 96], sizes = [2, 32], strides = [1, 1]} : vector<2x128xf32> to vector<2x32xf32>
    %35 = arith.mulf %32, %20 : vector<2x32xf32>
    %36 = arith.mulf %31, %33 : vector<2x32xf32>
    %37 = arith.addf %35, %36 : vector<2x32xf32>
    %38 = math.tanh %37 : vector<2x32xf32>
    %39 = arith.mulf %34, %38 : vector<2x32xf32>
    %40 = tpu.concatenate %39, %21 in 1 : vector<2x32xf32>, vector<2x32xf32> -> vector<2x64xf32>
    %cst_17 = arith.constant dense<0.000000e+00> : vector<2x128xf32>
    %41 = tpu.matmul %40, %1, %cst_17 {dimension_numbers = #tpu.dot_dimension_numbers<[1], [0], [0], [1], [0, 0, 1, 1], [], []>} : vector<2x64xf32>, vector<64x128xf32>, vector<2x128xf32> -> vector<2x128xf32>
    %42 = arith.addf %41, %4 : vector<2x128xf32>
    %43 = arith.negf %42 : vector<2x128xf32>
    %44 = math.exp %43 : vector<2x128xf32>
    %cst_18 = arith.constant 1.000000e+00 : f32
    %45 = vector.broadcast %cst_18 : f32 to vector<2x128xf32>
    %46 = arith.addf %45, %44 : vector<2x128xf32>
    %47 = arith.divf %45, %46 : vector<2x128xf32>
    %48 = math.tanh %42 : vector<2x128xf32>
    %49 = vector.extract_strided_slice %47 {offsets = [0, 0], sizes = [2, 32], strides = [1, 1]} : vector<2x128xf32> to vector<2x32xf32>
    %50 = vector.extract_strided_slice %47 {offsets = [0, 32], sizes = [2, 32], strides = [1, 1]} : vector<2x128xf32> to vector<2x32xf32>
    %51 = vector.extract_strided_slice %48 {offsets = [0, 64], sizes = [2, 32], strides = [1, 1]} : vector<2x128xf32> to vector<2x32xf32>
    %52 = vector.extract_strided_slice %47 {offsets = [0, 96], sizes = [2, 32], strides = [1, 1]} : vector<2x128xf32> to vector<2x32xf32>
    %53 = arith.mulf %50, %22 : vector<2x32xf32>
    %54 = arith.mulf %49, %51 : vector<2x32xf32>
    %55 = arith.addf %53, %54 : vector<2x32xf32>
    %56 = math.tanh %55 : vector<2x32xf32>
    %57 = arith.mulf %52, %56 : vector<2x32xf32>
    %cst_19 = arith.constant dense<0.000000e+00> : vector<2x128xf32>
    %58 = tpu.matmul %39, %0, %cst_19 {dimension_numbers = #tpu.dot_dimension_numbers<[1], [0], [0], [1], [0, 0, 1, 1], [], []>} : vector<2x32xf32>, vector<32x128xf32>, vector<2x128xf32> -> vector<2x128xf32>
    %59 = arith.addf %12, %58 : vector<2x128xf32>
    %60 = arith.negf %59 : vector<2x128xf32>
    %61 = math.exp %60 : vector<2x128xf32>
    %cst_20 = arith.constant 1.000000e+00 : f32
    %62 = vector.broadcast %cst_20 : f32 to vector<2x128xf32>
    %63 = arith.addf %62, %61 : vector<2x128xf32>
    %64 = arith.divf %62, %63 : vector<2x128xf32>
    %65 = math.tanh %59 : vector<2x128xf32>
    %66 = vector.extract_strided_slice %64 {offsets = [0, 0], sizes = [2, 32], strides = [1, 1]} : vector<2x128xf32> to vector<2x32xf32>
    %67 = vector.extract_strided_slice %64 {offsets = [0, 32], sizes = [2, 32], strides = [1, 1]} : vector<2x128xf32> to vector<2x32xf32>
    %68 = vector.extract_strided_slice %65 {offsets = [0, 64], sizes = [2, 32], strides = [1, 1]} : vector<2x128xf32> to vector<2x32xf32>
    %69 = vector.extract_strided_slice %64 {offsets = [0, 96], sizes = [2, 32], strides = [1, 1]} : vector<2x128xf32> to vector<2x32xf32>
    %70 = arith.mulf %67, %37 : vector<2x32xf32>
    %71 = arith.mulf %66, %68 : vector<2x32xf32>
    %72 = arith.addf %70, %71 : vector<2x32xf32>
    %73 = math.tanh %72 : vector<2x32xf32>
    %74 = arith.mulf %69, %73 : vector<2x32xf32>
    %75 = tpu.concatenate %74, %57 in 1 : vector<2x32xf32>, vector<2x32xf32> -> vector<2x64xf32>
    %cst_21 = arith.constant dense<0.000000e+00> : vector<2x128xf32>
    %76 = tpu.matmul %75, %1, %cst_21 {dimension_numbers = #tpu.dot_dimension_numbers<[1], [0], [0], [1], [0, 0, 1, 1], [], []>} : vector<2x64xf32>, vector<64x128xf32>, vector<2x128xf32> -> vector<2x128xf32>
    %77 = arith.addf %76, %4 : vector<2x128xf32>
    %78 = arith.negf %77 : vector<2x128xf32>
    %79 = math.exp %78 : vector<2x128xf32>
    %cst_22 = arith.constant 1.000000e+00 : f32
    %80 = vector.broadcast %cst_22 : f32 to vector<2x128xf32>
    %81 = arith.addf %80, %79 : vector<2x128xf32>
    %82 = arith.divf %80, %81 : vector<2x128xf32>
    %83 = math.tanh %77 : vector<2x128xf32>
    %84 = vector.extract_strided_slice %82 {offsets = [0, 0], sizes = [2, 32], strides = [1, 1]} : vector<2x128xf32> to vector<2x32xf32>
    %85 = vector.extract_strided_slice %82 {offsets = [0, 32], sizes = [2, 32], strides = [1, 1]} : vector<2x128xf32> to vector<2x32xf32>
    %86 = vector.extract_strided_slice %83 {offsets = [0, 64], sizes = [2, 32], strides = [1, 1]} : vector<2x128xf32> to vector<2x32xf32>
    %87 = vector.extract_strided_slice %82 {offsets = [0, 96], sizes = [2, 32], strides = [1, 1]} : vector<2x128xf32> to vector<2x32xf32>
    %88 = arith.mulf %85, %55 : vector<2x32xf32>
    %89 = arith.mulf %84, %86 : vector<2x32xf32>
    %90 = arith.addf %88, %89 : vector<2x32xf32>
    %91 = math.tanh %90 : vector<2x32xf32>
    %92 = arith.mulf %87, %91 : vector<2x32xf32>
    %cst_23 = arith.constant dense<0.000000e+00> : vector<2x128xf32>
    %93 = tpu.matmul %74, %0, %cst_23 {dimension_numbers = #tpu.dot_dimension_numbers<[1], [0], [0], [1], [0, 0, 1, 1], [], []>} : vector<2x32xf32>, vector<32x128xf32>, vector<2x128xf32> -> vector<2x128xf32>
    %94 = arith.addf %13, %93 : vector<2x128xf32>
    %95 = arith.negf %94 : vector<2x128xf32>
    %96 = math.exp %95 : vector<2x128xf32>
    %cst_24 = arith.constant 1.000000e+00 : f32
    %97 = vector.broadcast %cst_24 : f32 to vector<2x128xf32>
    %98 = arith.addf %97, %96 : vector<2x128xf32>
    %99 = arith.divf %97, %98 : vector<2x128xf32>
    %100 = math.tanh %94 : vector<2x128xf32>
    %101 = vector.extract_strided_slice %99 {offsets = [0, 0], sizes = [2, 32], strides = [1, 1]} : vector<2x128xf32> to vector<2x32xf32>
    %102 = vector.extract_strided_slice %99 {offsets = [0, 32], sizes = [2, 32], strides = [1, 1]} : vector<2x128xf32> to vector<2x32xf32>
    %103 = vector.extract_strided_slice %100 {offsets = [0, 64], sizes = [2, 32], strides = [1, 1]} : vector<2x128xf32> to vector<2x32xf32>
    %104 = vector.extract_strided_slice %99 {offsets = [0, 96], sizes = [2, 32], strides = [1, 1]} : vector<2x128xf32> to vector<2x32xf32>
    %105 = arith.mulf %102, %72 : vector<2x32xf32>
    %106 = arith.mulf %101, %103 : vector<2x32xf32>
    %107 = arith.addf %105, %106 : vector<2x32xf32>
    %108 = math.tanh %107 : vector<2x32xf32>
    %109 = arith.mulf %104, %108 : vector<2x32xf32>
    %110 = tpu.concatenate %109, %92 in 1 : vector<2x32xf32>, vector<2x32xf32> -> vector<2x64xf32>
    %cst_25 = arith.constant dense<0.000000e+00> : vector<2x128xf32>
    %111 = tpu.matmul %110, %1, %cst_25 {dimension_numbers = #tpu.dot_dimension_numbers<[1], [0], [0], [1], [0, 0, 1, 1], [], []>} : vector<2x64xf32>, vector<64x128xf32>, vector<2x128xf32> -> vector<2x128xf32>
    %112 = arith.addf %111, %4 : vector<2x128xf32>
    %113 = arith.negf %112 : vector<2x128xf32>
    %114 = math.exp %113 : vector<2x128xf32>
    %cst_26 = arith.constant 1.000000e+00 : f32
    %115 = vector.broadcast %cst_26 : f32 to vector<2x128xf32>
    %116 = arith.addf %115, %114 : vector<2x128xf32>
    %117 = arith.divf %115, %116 : vector<2x128xf32>
    %118 = math.tanh %112 : vector<2x128xf32>
    %119 = vector.extract_strided_slice %117 {offsets = [0, 0], sizes = [2, 32], strides = [1, 1]} : vector<2x128xf32> to vector<2x32xf32>
    %120 = vector.extract_strided_slice %117 {offsets = [0, 32], sizes = [2, 32], strides = [1, 1]} : vector<2x128xf32> to vector<2x32xf32>
    %121 = vector.extract_strided_slice %118 {offsets = [0, 64], sizes = [2, 32], strides = [1, 1]} : vector<2x128xf32> to vector<2x32xf32>
    %122 = vector.extract_strided_slice %117 {offsets = [0, 96], sizes = [2, 32], strides = [1, 1]} : vector<2x128xf32> to vector<2x32xf32>
    %123 = arith.mulf %120, %90 : vector<2x32xf32>
    %124 = arith.mulf %119, %121 : vector<2x32xf32>
    %125 = arith.addf %123, %124 : vector<2x32xf32>
    %126 = math.tanh %125 : vector<2x32xf32>
    %127 = arith.mulf %122, %126 : vector<2x32xf32>
    %cst_27 = arith.constant dense<0.000000e+00> : vector<2x128xf32>
    %128 = tpu.matmul %109, %0, %cst_27 {dimension_numbers = #tpu.dot_dimension_numbers<[1], [0], [0], [1], [0, 0, 1, 1], [], []>} : vector<2x32xf32>, vector<32x128xf32>, vector<2x128xf32> -> vector<2x128xf32>
    %129 = arith.addf %14, %128 : vector<2x128xf32>
    %130 = arith.negf %129 : vector<2x128xf32>
    %131 = math.exp %130 : vector<2x128xf32>
    %cst_28 = arith.constant 1.000000e+00 : f32
    %132 = vector.broadcast %cst_28 : f32 to vector<2x128xf32>
    %133 = arith.addf %132, %131 : vector<2x128xf32>
    %134 = arith.divf %132, %133 : vector<2x128xf32>
    %135 = math.tanh %129 : vector<2x128xf32>
    %136 = vector.extract_strided_slice %134 {offsets = [0, 0], sizes = [2, 32], strides = [1, 1]} : vector<2x128xf32> to vector<2x32xf32>
    %137 = vector.extract_strided_slice %134 {offsets = [0, 32], sizes = [2, 32], strides = [1, 1]} : vector<2x128xf32> to vector<2x32xf32>
    %138 = vector.extract_strided_slice %135 {offsets = [0, 64], sizes = [2, 32], strides = [1, 1]} : vector<2x128xf32> to vector<2x32xf32>
    %139 = vector.extract_strided_slice %134 {offsets = [0, 96], sizes = [2, 32], strides = [1, 1]} : vector<2x128xf32> to vector<2x32xf32>
    %140 = arith.mulf %137, %107 : vector<2x32xf32>
    %141 = arith.mulf %136, %138 : vector<2x32xf32>
    %142 = arith.addf %140, %141 : vector<2x32xf32>
    %143 = math.tanh %142 : vector<2x32xf32>
    %144 = arith.mulf %139, %143 : vector<2x32xf32>
    %145 = tpu.concatenate %144, %127 in 1 : vector<2x32xf32>, vector<2x32xf32> -> vector<2x64xf32>
    %cst_29 = arith.constant dense<0.000000e+00> : vector<2x128xf32>
    %146 = tpu.matmul %145, %1, %cst_29 {dimension_numbers = #tpu.dot_dimension_numbers<[1], [0], [0], [1], [0, 0, 1, 1], [], []>} : vector<2x64xf32>, vector<64x128xf32>, vector<2x128xf32> -> vector<2x128xf32>
    %147 = arith.addf %146, %4 : vector<2x128xf32>
    %148 = arith.negf %147 : vector<2x128xf32>
    %149 = math.exp %148 : vector<2x128xf32>
    %cst_30 = arith.constant 1.000000e+00 : f32
    %150 = vector.broadcast %cst_30 : f32 to vector<2x128xf32>
    %151 = arith.addf %150, %149 : vector<2x128xf32>
    %152 = arith.divf %150, %151 : vector<2x128xf32>
    %153 = math.tanh %147 : vector<2x128xf32>
    %154 = vector.extract_strided_slice %152 {offsets = [0, 0], sizes = [2, 32], strides = [1, 1]} : vector<2x128xf32> to vector<2x32xf32>
    %155 = vector.extract_strided_slice %152 {offsets = [0, 32], sizes = [2, 32], strides = [1, 1]} : vector<2x128xf32> to vector<2x32xf32>
    %156 = vector.extract_strided_slice %153 {offsets = [0, 64], sizes = [2, 32], strides = [1, 1]} : vector<2x128xf32> to vector<2x32xf32>
    %157 = vector.extract_strided_slice %152 {offsets = [0, 96], sizes = [2, 32], strides = [1, 1]} : vector<2x128xf32> to vector<2x32xf32>
    %158 = arith.mulf %155, %125 : vector<2x32xf32>
    %159 = arith.mulf %154, %156 : vector<2x32xf32>
    %160 = arith.addf %158, %159 : vector<2x32xf32>
    %161 = math.tanh %160 : vector<2x32xf32>
    %162 = arith.mulf %157, %161 : vector<2x32xf32>
    %cst_31 = arith.constant dense<0.000000e+00> : vector<2x128xf32>
    %163 = tpu.matmul %144, %0, %cst_31 {dimension_numbers = #tpu.dot_dimension_numbers<[1], [0], [0], [1], [0, 0, 1, 1], [], []>} : vector<2x32xf32>, vector<32x128xf32>, vector<2x128xf32> -> vector<2x128xf32>
    %164 = arith.addf %15, %163 : vector<2x128xf32>
    %165 = arith.negf %164 : vector<2x128xf32>
    %166 = math.exp %165 : vector<2x128xf32>
    %cst_32 = arith.constant 1.000000e+00 : f32
    %167 = vector.broadcast %cst_32 : f32 to vector<2x128xf32>
    %168 = arith.addf %167, %166 : vector<2x128xf32>
    %169 = arith.divf %167, %168 : vector<2x128xf32>
    %170 = math.tanh %164 : vector<2x128xf32>
    %171 = vector.extract_strided_slice %169 {offsets = [0, 0], sizes = [2, 32], strides = [1, 1]} : vector<2x128xf32> to vector<2x32xf32>
    %172 = vector.extract_strided_slice %169 {offsets = [0, 32], sizes = [2, 32], strides = [1, 1]} : vector<2x128xf32> to vector<2x32xf32>
    %173 = vector.extract_strided_slice %170 {offsets = [0, 64], sizes = [2, 32], strides = [1, 1]} : vector<2x128xf32> to vector<2x32xf32>
    %174 = vector.extract_strided_slice %169 {offsets = [0, 96], sizes = [2, 32], strides = [1, 1]} : vector<2x128xf32> to vector<2x32xf32>
    %175 = arith.mulf %172, %142 : vector<2x32xf32>
    %176 = arith.mulf %171, %173 : vector<2x32xf32>
    %177 = arith.addf %175, %176 : vector<2x32xf32>
    %178 = math.tanh %177 : vector<2x32xf32>
    %179 = arith.mulf %174, %178 : vector<2x32xf32>
    %180 = tpu.concatenate %179, %162 in 1 : vector<2x32xf32>, vector<2x32xf32> -> vector<2x64xf32>
    %cst_33 = arith.constant dense<0.000000e+00> : vector<2x128xf32>
    %181 = tpu.matmul %180, %1, %cst_33 {dimension_numbers = #tpu.dot_dimension_numbers<[1], [0], [0], [1], [0, 0, 1, 1], [], []>} : vector<2x64xf32>, vector<64x128xf32>, vector<2x128xf32> -> vector<2x128xf32>
    %182 = arith.addf %181, %4 : vector<2x128xf32>
    %183 = arith.negf %182 : vector<2x128xf32>
    %184 = math.exp %183 : vector<2x128xf32>
    %cst_34 = arith.constant 1.000000e+00 : f32
    %185 = vector.broadcast %cst_34 : f32 to vector<2x128xf32>
    %186 = arith.addf %185, %184 : vector<2x128xf32>
    %187 = arith.divf %185, %186 : vector<2x128xf32>
    %188 = math.tanh %182 : vector<2x128xf32>
    %189 = vector.extract_strided_slice %187 {offsets = [0, 0], sizes = [2, 32], strides = [1, 1]} : vector<2x128xf32> to vector<2x32xf32>
    %190 = vector.extract_strided_slice %187 {offsets = [0, 32], sizes = [2, 32], strides = [1, 1]} : vector<2x128xf32> to vector<2x32xf32>
    %191 = vector.extract_strided_slice %188 {offsets = [0, 64], sizes = [2, 32], strides = [1, 1]} : vector<2x128xf32> to vector<2x32xf32>
    %192 = vector.extract_strided_slice %187 {offsets = [0, 96], sizes = [2, 32], strides = [1, 1]} : vector<2x128xf32> to vector<2x32xf32>
    %193 = arith.mulf %190, %160 : vector<2x32xf32>
    %194 = arith.mulf %189, %191 : vector<2x32xf32>
    %195 = arith.addf %193, %194 : vector<2x32xf32>
    %196 = math.tanh %195 : vector<2x32xf32>
    %197 = arith.mulf %192, %196 : vector<2x32xf32>
    %cst_35 = arith.constant dense<0.000000e+00> : vector<2x128xf32>
    %198 = tpu.matmul %179, %0, %cst_35 {dimension_numbers = #tpu.dot_dimension_numbers<[1], [0], [0], [1], [0, 0, 1, 1], [], []>} : vector<2x32xf32>, vector<32x128xf32>, vector<2x128xf32> -> vector<2x128xf32>
    %199 = arith.addf %16, %198 : vector<2x128xf32>
    %200 = arith.negf %199 : vector<2x128xf32>
    %201 = math.exp %200 : vector<2x128xf32>
    %cst_36 = arith.constant 1.000000e+00 : f32
    %202 = vector.broadcast %cst_36 : f32 to vector<2x128xf32>
    %203 = arith.addf %202, %201 : vector<2x128xf32>
    %204 = arith.divf %202, %203 : vector<2x128xf32>
    %205 = math.tanh %199 : vector<2x128xf32>
    %206 = vector.extract_strided_slice %204 {offsets = [0, 0], sizes = [2, 32], strides = [1, 1]} : vector<2x128xf32> to vector<2x32xf32>
    %207 = vector.extract_strided_slice %204 {offsets = [0, 32], sizes = [2, 32], strides = [1, 1]} : vector<2x128xf32> to vector<2x32xf32>
    %208 = vector.extract_strided_slice %205 {offsets = [0, 64], sizes = [2, 32], strides = [1, 1]} : vector<2x128xf32> to vector<2x32xf32>
    %209 = vector.extract_strided_slice %204 {offsets = [0, 96], sizes = [2, 32], strides = [1, 1]} : vector<2x128xf32> to vector<2x32xf32>
    %210 = arith.mulf %207, %177 : vector<2x32xf32>
    %211 = arith.mulf %206, %208 : vector<2x32xf32>
    %212 = arith.addf %210, %211 : vector<2x32xf32>
    %213 = math.tanh %212 : vector<2x32xf32>
    %214 = arith.mulf %209, %213 : vector<2x32xf32>
    %215 = tpu.concatenate %214, %197 in 1 : vector<2x32xf32>, vector<2x32xf32> -> vector<2x64xf32>
    %cst_37 = arith.constant dense<0.000000e+00> : vector<2x128xf32>
    %216 = tpu.matmul %215, %1, %cst_37 {dimension_numbers = #tpu.dot_dimension_numbers<[1], [0], [0], [1], [0, 0, 1, 1], [], []>} : vector<2x64xf32>, vector<64x128xf32>, vector<2x128xf32> -> vector<2x128xf32>
    %217 = arith.addf %216, %4 : vector<2x128xf32>
    %218 = arith.negf %217 : vector<2x128xf32>
    %219 = math.exp %218 : vector<2x128xf32>
    %cst_38 = arith.constant 1.000000e+00 : f32
    %220 = vector.broadcast %cst_38 : f32 to vector<2x128xf32>
    %221 = arith.addf %220, %219 : vector<2x128xf32>
    %222 = arith.divf %220, %221 : vector<2x128xf32>
    %223 = math.tanh %217 : vector<2x128xf32>
    %224 = vector.extract_strided_slice %222 {offsets = [0, 0], sizes = [2, 32], strides = [1, 1]} : vector<2x128xf32> to vector<2x32xf32>
    %225 = vector.extract_strided_slice %222 {offsets = [0, 32], sizes = [2, 32], strides = [1, 1]} : vector<2x128xf32> to vector<2x32xf32>
    %226 = vector.extract_strided_slice %223 {offsets = [0, 64], sizes = [2, 32], strides = [1, 1]} : vector<2x128xf32> to vector<2x32xf32>
    %227 = vector.extract_strided_slice %222 {offsets = [0, 96], sizes = [2, 32], strides = [1, 1]} : vector<2x128xf32> to vector<2x32xf32>
    %228 = arith.mulf %225, %195 : vector<2x32xf32>
    %229 = arith.mulf %224, %226 : vector<2x32xf32>
    %230 = arith.addf %228, %229 : vector<2x32xf32>
    %231 = math.tanh %230 : vector<2x32xf32>
    %232 = arith.mulf %227, %231 : vector<2x32xf32>
    %cst_39 = arith.constant dense<0.000000e+00> : vector<2x128xf32>
    %233 = tpu.matmul %214, %0, %cst_39 {dimension_numbers = #tpu.dot_dimension_numbers<[1], [0], [0], [1], [0, 0, 1, 1], [], []>} : vector<2x32xf32>, vector<32x128xf32>, vector<2x128xf32> -> vector<2x128xf32>
    %234 = arith.addf %17, %233 : vector<2x128xf32>
    %235 = arith.negf %234 : vector<2x128xf32>
    %236 = math.exp %235 : vector<2x128xf32>
    %cst_40 = arith.constant 1.000000e+00 : f32
    %237 = vector.broadcast %cst_40 : f32 to vector<2x128xf32>
    %238 = arith.addf %237, %236 : vector<2x128xf32>
    %239 = arith.divf %237, %238 : vector<2x128xf32>
    %240 = math.tanh %234 : vector<2x128xf32>
    %241 = vector.extract_strided_slice %239 {offsets = [0, 0], sizes = [2, 32], strides = [1, 1]} : vector<2x128xf32> to vector<2x32xf32>
    %242 = vector.extract_strided_slice %239 {offsets = [0, 32], sizes = [2, 32], strides = [1, 1]} : vector<2x128xf32> to vector<2x32xf32>
    %243 = vector.extract_strided_slice %240 {offsets = [0, 64], sizes = [2, 32], strides = [1, 1]} : vector<2x128xf32> to vector<2x32xf32>
    %244 = vector.extract_strided_slice %239 {offsets = [0, 96], sizes = [2, 32], strides = [1, 1]} : vector<2x128xf32> to vector<2x32xf32>
    %245 = arith.mulf %242, %212 : vector<2x32xf32>
    %246 = arith.mulf %241, %243 : vector<2x32xf32>
    %247 = arith.addf %245, %246 : vector<2x32xf32>
    %248 = math.tanh %247 : vector<2x32xf32>
    %249 = arith.mulf %244, %248 : vector<2x32xf32>
    %250 = tpu.concatenate %249, %232 in 1 : vector<2x32xf32>, vector<2x32xf32> -> vector<2x64xf32>
    %cst_41 = arith.constant dense<0.000000e+00> : vector<2x128xf32>
    %251 = tpu.matmul %250, %1, %cst_41 {dimension_numbers = #tpu.dot_dimension_numbers<[1], [0], [0], [1], [0, 0, 1, 1], [], []>} : vector<2x64xf32>, vector<64x128xf32>, vector<2x128xf32> -> vector<2x128xf32>
    %252 = arith.addf %251, %4 : vector<2x128xf32>
    %253 = arith.negf %252 : vector<2x128xf32>
    %254 = math.exp %253 : vector<2x128xf32>
    %cst_42 = arith.constant 1.000000e+00 : f32
    %255 = vector.broadcast %cst_42 : f32 to vector<2x128xf32>
    %256 = arith.addf %255, %254 : vector<2x128xf32>
    %257 = arith.divf %255, %256 : vector<2x128xf32>
    %258 = math.tanh %252 : vector<2x128xf32>
    %259 = vector.extract_strided_slice %257 {offsets = [0, 0], sizes = [2, 32], strides = [1, 1]} : vector<2x128xf32> to vector<2x32xf32>
    %260 = vector.extract_strided_slice %257 {offsets = [0, 32], sizes = [2, 32], strides = [1, 1]} : vector<2x128xf32> to vector<2x32xf32>
    %261 = vector.extract_strided_slice %258 {offsets = [0, 64], sizes = [2, 32], strides = [1, 1]} : vector<2x128xf32> to vector<2x32xf32>
    %262 = vector.extract_strided_slice %257 {offsets = [0, 96], sizes = [2, 32], strides = [1, 1]} : vector<2x128xf32> to vector<2x32xf32>
    %263 = arith.mulf %260, %230 : vector<2x32xf32>
    %264 = arith.mulf %259, %261 : vector<2x32xf32>
    %265 = arith.addf %263, %264 : vector<2x32xf32>
    %266 = math.tanh %265 : vector<2x32xf32>
    %267 = arith.mulf %262, %266 : vector<2x32xf32>
    %cst_43 = arith.constant dense<0.000000e+00> : vector<2x128xf32>
    %268 = tpu.matmul %249, %0, %cst_43 {dimension_numbers = #tpu.dot_dimension_numbers<[1], [0], [0], [1], [0, 0, 1, 1], [], []>} : vector<2x32xf32>, vector<32x128xf32>, vector<2x128xf32> -> vector<2x128xf32>
    %269 = arith.addf %18, %268 : vector<2x128xf32>
    %270 = arith.negf %269 : vector<2x128xf32>
    %271 = math.exp %270 : vector<2x128xf32>
    %cst_44 = arith.constant 1.000000e+00 : f32
    %272 = vector.broadcast %cst_44 : f32 to vector<2x128xf32>
    %273 = arith.addf %272, %271 : vector<2x128xf32>
    %274 = arith.divf %272, %273 : vector<2x128xf32>
    %275 = math.tanh %269 : vector<2x128xf32>
    %276 = vector.extract_strided_slice %274 {offsets = [0, 0], sizes = [2, 32], strides = [1, 1]} : vector<2x128xf32> to vector<2x32xf32>
    %277 = vector.extract_strided_slice %274 {offsets = [0, 32], sizes = [2, 32], strides = [1, 1]} : vector<2x128xf32> to vector<2x32xf32>
    %278 = vector.extract_strided_slice %275 {offsets = [0, 64], sizes = [2, 32], strides = [1, 1]} : vector<2x128xf32> to vector<2x32xf32>
    %279 = vector.extract_strided_slice %274 {offsets = [0, 96], sizes = [2, 32], strides = [1, 1]} : vector<2x128xf32> to vector<2x32xf32>
    %280 = arith.mulf %277, %247 : vector<2x32xf32>
    %281 = arith.mulf %276, %278 : vector<2x32xf32>
    %282 = arith.addf %280, %281 : vector<2x32xf32>
    %283 = math.tanh %282 : vector<2x32xf32>
    %284 = arith.mulf %279, %283 : vector<2x32xf32>
    %285 = tpu.concatenate %284, %267 in 1 : vector<2x32xf32>, vector<2x32xf32> -> vector<2x64xf32>
    %cst_45 = arith.constant dense<0.000000e+00> : vector<2x128xf32>
    %286 = tpu.matmul %285, %1, %cst_45 {dimension_numbers = #tpu.dot_dimension_numbers<[1], [0], [0], [1], [0, 0, 1, 1], [], []>} : vector<2x64xf32>, vector<64x128xf32>, vector<2x128xf32> -> vector<2x128xf32>
    %287 = arith.addf %286, %4 : vector<2x128xf32>
    %288 = arith.negf %287 : vector<2x128xf32>
    %289 = math.exp %288 : vector<2x128xf32>
    %cst_46 = arith.constant 1.000000e+00 : f32
    %290 = vector.broadcast %cst_46 : f32 to vector<2x128xf32>
    %291 = arith.addf %290, %289 : vector<2x128xf32>
    %292 = arith.divf %290, %291 : vector<2x128xf32>
    %293 = math.tanh %287 : vector<2x128xf32>
    %294 = vector.extract_strided_slice %292 {offsets = [0, 0], sizes = [2, 32], strides = [1, 1]} : vector<2x128xf32> to vector<2x32xf32>
    %295 = vector.extract_strided_slice %292 {offsets = [0, 32], sizes = [2, 32], strides = [1, 1]} : vector<2x128xf32> to vector<2x32xf32>
    %296 = vector.extract_strided_slice %293 {offsets = [0, 64], sizes = [2, 32], strides = [1, 1]} : vector<2x128xf32> to vector<2x32xf32>
    %297 = vector.extract_strided_slice %292 {offsets = [0, 96], sizes = [2, 32], strides = [1, 1]} : vector<2x128xf32> to vector<2x32xf32>
    %298 = arith.mulf %295, %265 : vector<2x32xf32>
    %299 = arith.mulf %294, %296 : vector<2x32xf32>
    %300 = arith.addf %298, %299 : vector<2x32xf32>
    %301 = math.tanh %300 : vector<2x32xf32>
    %302 = arith.mulf %297, %301 : vector<2x32xf32>
    %303 = vector.extract_strided_slice %57 {offsets = [0, 0], sizes = [1, 32], strides = [1, 1]} : vector<2x32xf32> to vector<1x32xf32>
    %304 = vector.extract_strided_slice %92 {offsets = [0, 0], sizes = [1, 32], strides = [1, 1]} : vector<2x32xf32> to vector<1x32xf32>
    %305 = vector.extract_strided_slice %127 {offsets = [0, 0], sizes = [1, 32], strides = [1, 1]} : vector<2x32xf32> to vector<1x32xf32>
    %306 = vector.extract_strided_slice %162 {offsets = [0, 0], sizes = [1, 32], strides = [1, 1]} : vector<2x32xf32> to vector<1x32xf32>
    %307 = vector.extract_strided_slice %197 {offsets = [0, 0], sizes = [1, 32], strides = [1, 1]} : vector<2x32xf32> to vector<1x32xf32>
    %308 = vector.extract_strided_slice %232 {offsets = [0, 0], sizes = [1, 32], strides = [1, 1]} : vector<2x32xf32> to vector<1x32xf32>
    %309 = vector.extract_strided_slice %267 {offsets = [0, 0], sizes = [1, 32], strides = [1, 1]} : vector<2x32xf32> to vector<1x32xf32>
    %310 = vector.extract_strided_slice %302 {offsets = [0, 0], sizes = [1, 32], strides = [1, 1]} : vector<2x32xf32> to vector<1x32xf32>
    %311 = vector.extract_strided_slice %57 {offsets = [1, 0], sizes = [1, 32], strides = [1, 1]} : vector<2x32xf32> to vector<1x32xf32>
    %312 = vector.extract_strided_slice %92 {offsets = [1, 0], sizes = [1, 32], strides = [1, 1]} : vector<2x32xf32> to vector<1x32xf32>
    %313 = vector.extract_strided_slice %127 {offsets = [1, 0], sizes = [1, 32], strides = [1, 1]} : vector<2x32xf32> to vector<1x32xf32>
    %314 = vector.extract_strided_slice %162 {offsets = [1, 0], sizes = [1, 32], strides = [1, 1]} : vector<2x32xf32> to vector<1x32xf32>
    %315 = vector.extract_strided_slice %197 {offsets = [1, 0], sizes = [1, 32], strides = [1, 1]} : vector<2x32xf32> to vector<1x32xf32>
    %316 = vector.extract_strided_slice %232 {offsets = [1, 0], sizes = [1, 32], strides = [1, 1]} : vector<2x32xf32> to vector<1x32xf32>
    %317 = vector.extract_strided_slice %267 {offsets = [1, 0], sizes = [1, 32], strides = [1, 1]} : vector<2x32xf32> to vector<1x32xf32>
    %318 = vector.extract_strided_slice %302 {offsets = [1, 0], sizes = [1, 32], strides = [1, 1]} : vector<2x32xf32> to vector<1x32xf32>
    %319 = tpu.concatenate %303, %304, %305, %306, %307, %308, %309, %310, %311, %312, %313, %314, %315, %316, %317, %318 in 0 : vector<1x32xf32>, vector<1x32xf32>, vector<1x32xf32>, vector<1x32xf32>, vector<1x32xf32>, vector<1x32xf32>, vector<1x32xf32>, vector<1x32xf32>, vector<1x32xf32>, vector<1x32xf32>, vector<1x32xf32>, vector<1x32xf32>, vector<1x32xf32>, vector<1x32xf32>, vector<1x32xf32>, vector<1x32xf32> -> vector<16x32xf32>
    %c0_47 = arith.constant 0 : index
    %c0_48 = arith.constant 0 : index
    %320 = vector.load %arg7[%c0_47, %c0_48] : memref<32x96xf32, #tpu.memory_space<vmem>>, vector<32x96xf32>
    %cst_49 = arith.constant dense<0.000000e+00> : vector<16x96xf32>
    %321 = tpu.matmul %319, %320, %cst_49 {dimension_numbers = #tpu.dot_dimension_numbers<[1], [0], [0], [1], [0, 0, 1, 1], [], []>} : vector<16x32xf32>, vector<32x96xf32>, vector<16x96xf32> -> vector<16x96xf32>
    %c0_50 = arith.constant 0 : index
    %c0_51 = arith.constant 0 : index
    %322 = vector.load %arg8[%c0_50, %c0_51] : memref<1x96xf32, #tpu.memory_space<vmem>>, vector<1x96xf32>
    %323 = vector.broadcast %322 : vector<1x96xf32> to vector<16x96xf32>
    %324 = arith.addf %321, %323 : vector<16x96xf32>
    %325 = vector.extract_strided_slice %324 {offsets = [0, 0], sizes = [8, 8], strides = [1, 1]} : vector<16x96xf32> to vector<8x8xf32>
    %326 = vector.extract_strided_slice %324 {offsets = [0, 32], sizes = [8, 8], strides = [1, 1]} : vector<16x96xf32> to vector<8x8xf32>
    %327 = tpu.transpose %326, [1, 0] : vector<8x8xf32> -> vector<8x8xf32>
    %cst_52 = arith.constant dense<0.000000e+00> : vector<8x8xf32>
    %328 = tpu.matmul %325, %327, %cst_52 {dimension_numbers = #tpu.dot_dimension_numbers<[1], [0], [0], [1], [0, 0, 1, 1], [], []>} : vector<8x8xf32>, vector<8x8xf32>, vector<8x8xf32> -> vector<8x8xf32>
    %cst_53 = arith.constant 0.353553385 : f32
    %329 = vector.broadcast %cst_53 : f32 to vector<8x8xf32>
    %330 = arith.mulf %328, %329 : vector<8x8xf32>
    %331 = vector.extract_strided_slice %324 {offsets = [0, 8], sizes = [8, 8], strides = [1, 1]} : vector<16x96xf32> to vector<8x8xf32>
    %332 = vector.extract_strided_slice %324 {offsets = [0, 40], sizes = [8, 8], strides = [1, 1]} : vector<16x96xf32> to vector<8x8xf32>
    %333 = tpu.transpose %332, [1, 0] : vector<8x8xf32> -> vector<8x8xf32>
    %cst_54 = arith.constant dense<0.000000e+00> : vector<8x8xf32>
    %334 = tpu.matmul %331, %333, %cst_54 {dimension_numbers = #tpu.dot_dimension_numbers<[1], [0], [0], [1], [0, 0, 1, 1], [], []>} : vector<8x8xf32>, vector<8x8xf32>, vector<8x8xf32> -> vector<8x8xf32>
    %cst_55 = arith.constant 0.353553385 : f32
    %335 = vector.broadcast %cst_55 : f32 to vector<8x8xf32>
    %336 = arith.mulf %334, %335 : vector<8x8xf32>
    %337 = vector.extract_strided_slice %324 {offsets = [0, 16], sizes = [8, 8], strides = [1, 1]} : vector<16x96xf32> to vector<8x8xf32>
    %338 = vector.extract_strided_slice %324 {offsets = [0, 48], sizes = [8, 8], strides = [1, 1]} : vector<16x96xf32> to vector<8x8xf32>
    %339 = tpu.transpose %338, [1, 0] : vector<8x8xf32> -> vector<8x8xf32>
    %cst_56 = arith.constant dense<0.000000e+00> : vector<8x8xf32>
    %340 = tpu.matmul %337, %339, %cst_56 {dimension_numbers = #tpu.dot_dimension_numbers<[1], [0], [0], [1], [0, 0, 1, 1], [], []>} : vector<8x8xf32>, vector<8x8xf32>, vector<8x8xf32> -> vector<8x8xf32>
    %cst_57 = arith.constant 0.353553385 : f32
    %341 = vector.broadcast %cst_57 : f32 to vector<8x8xf32>
    %342 = arith.mulf %340, %341 : vector<8x8xf32>
    %343 = vector.extract_strided_slice %324 {offsets = [0, 24], sizes = [8, 8], strides = [1, 1]} : vector<16x96xf32> to vector<8x8xf32>
    %344 = vector.extract_strided_slice %324 {offsets = [0, 56], sizes = [8, 8], strides = [1, 1]} : vector<16x96xf32> to vector<8x8xf32>
    %345 = tpu.transpose %344, [1, 0] : vector<8x8xf32> -> vector<8x8xf32>
    %cst_58 = arith.constant dense<0.000000e+00> : vector<8x8xf32>
    %346 = tpu.matmul %343, %345, %cst_58 {dimension_numbers = #tpu.dot_dimension_numbers<[1], [0], [0], [1], [0, 0, 1, 1], [], []>} : vector<8x8xf32>, vector<8x8xf32>, vector<8x8xf32> -> vector<8x8xf32>
    %cst_59 = arith.constant 0.353553385 : f32
    %347 = vector.broadcast %cst_59 : f32 to vector<8x8xf32>
    %348 = arith.mulf %346, %347 : vector<8x8xf32>
    %349 = vector.extract_strided_slice %324 {offsets = [8, 0], sizes = [8, 8], strides = [1, 1]} : vector<16x96xf32> to vector<8x8xf32>
    %350 = vector.extract_strided_slice %324 {offsets = [8, 32], sizes = [8, 8], strides = [1, 1]} : vector<16x96xf32> to vector<8x8xf32>
    %351 = tpu.transpose %350, [1, 0] : vector<8x8xf32> -> vector<8x8xf32>
    %cst_60 = arith.constant dense<0.000000e+00> : vector<8x8xf32>
    %352 = tpu.matmul %349, %351, %cst_60 {dimension_numbers = #tpu.dot_dimension_numbers<[1], [0], [0], [1], [0, 0, 1, 1], [], []>} : vector<8x8xf32>, vector<8x8xf32>, vector<8x8xf32> -> vector<8x8xf32>
    %cst_61 = arith.constant 0.353553385 : f32
    %353 = vector.broadcast %cst_61 : f32 to vector<8x8xf32>
    %354 = arith.mulf %352, %353 : vector<8x8xf32>
    %355 = vector.extract_strided_slice %324 {offsets = [8, 8], sizes = [8, 8], strides = [1, 1]} : vector<16x96xf32> to vector<8x8xf32>
    %356 = vector.extract_strided_slice %324 {offsets = [8, 40], sizes = [8, 8], strides = [1, 1]} : vector<16x96xf32> to vector<8x8xf32>
    %357 = tpu.transpose %356, [1, 0] : vector<8x8xf32> -> vector<8x8xf32>
    %cst_62 = arith.constant dense<0.000000e+00> : vector<8x8xf32>
    %358 = tpu.matmul %355, %357, %cst_62 {dimension_numbers = #tpu.dot_dimension_numbers<[1], [0], [0], [1], [0, 0, 1, 1], [], []>} : vector<8x8xf32>, vector<8x8xf32>, vector<8x8xf32> -> vector<8x8xf32>
    %cst_63 = arith.constant 0.353553385 : f32
    %359 = vector.broadcast %cst_63 : f32 to vector<8x8xf32>
    %360 = arith.mulf %358, %359 : vector<8x8xf32>
    %361 = vector.extract_strided_slice %324 {offsets = [8, 16], sizes = [8, 8], strides = [1, 1]} : vector<16x96xf32> to vector<8x8xf32>
    %362 = vector.extract_strided_slice %324 {offsets = [8, 48], sizes = [8, 8], strides = [1, 1]} : vector<16x96xf32> to vector<8x8xf32>
    %363 = tpu.transpose %362, [1, 0] : vector<8x8xf32> -> vector<8x8xf32>
    %cst_64 = arith.constant dense<0.000000e+00> : vector<8x8xf32>
    %364 = tpu.matmul %361, %363, %cst_64 {dimension_numbers = #tpu.dot_dimension_numbers<[1], [0], [0], [1], [0, 0, 1, 1], [], []>} : vector<8x8xf32>, vector<8x8xf32>, vector<8x8xf32> -> vector<8x8xf32>
    %cst_65 = arith.constant 0.353553385 : f32
    %365 = vector.broadcast %cst_65 : f32 to vector<8x8xf32>
    %366 = arith.mulf %364, %365 : vector<8x8xf32>
    %367 = vector.extract_strided_slice %324 {offsets = [8, 24], sizes = [8, 8], strides = [1, 1]} : vector<16x96xf32> to vector<8x8xf32>
    %368 = vector.extract_strided_slice %324 {offsets = [8, 56], sizes = [8, 8], strides = [1, 1]} : vector<16x96xf32> to vector<8x8xf32>
    %369 = tpu.transpose %368, [1, 0] : vector<8x8xf32> -> vector<8x8xf32>
    %cst_66 = arith.constant dense<0.000000e+00> : vector<8x8xf32>
    %370 = tpu.matmul %367, %369, %cst_66 {dimension_numbers = #tpu.dot_dimension_numbers<[1], [0], [0], [1], [0, 0, 1, 1], [], []>} : vector<8x8xf32>, vector<8x8xf32>, vector<8x8xf32> -> vector<8x8xf32>
    %cst_67 = arith.constant 0.353553385 : f32
    %371 = vector.broadcast %cst_67 : f32 to vector<8x8xf32>
    %372 = arith.mulf %370, %371 : vector<8x8xf32>
    %373 = tpu.concatenate %330, %336, %342, %348, %354, %360, %366, %372 in 0 : vector<8x8xf32>, vector<8x8xf32>, vector<8x8xf32>, vector<8x8xf32>, vector<8x8xf32>, vector<8x8xf32>, vector<8x8xf32>, vector<8x8xf32> -> vector<64x8xf32>
    %cst_68 = arith.constant dense<0xFF800000> : vector<64xf32>
    %374 = vector.multi_reduction <maximumf>, %373, %cst_68 [1] : vector<64x8xf32> to vector<64xf32>
    %375 = vector.shape_cast %374 : vector<64xf32> to vector<64x1xf32>
    %376 = vector.broadcast %375 : vector<64x1xf32> to vector<64x8xf32>
    %377 = arith.subf %373, %376 : vector<64x8xf32>
    %378 = math.exp %377 : vector<64x8xf32>
    %cst_69 = arith.constant dense<0.000000e+00> : vector<64xf32>
    %379 = vector.multi_reduction <add>, %378, %cst_69 [1] : vector<64x8xf32> to vector<64xf32>
    %380 = vector.shape_cast %379 : vector<64xf32> to vector<64x1xf32>
    %381 = tpu.reciprocal %380 {approx = true} : vector<64x1xf32> -> vector<64x1xf32>
    %382 = vector.broadcast %381 : vector<64x1xf32> to vector<64x8xf32>
    %383 = arith.mulf %378, %382 : vector<64x8xf32>
    %384 = vector.extract_strided_slice %383 {offsets = [0, 0], sizes = [8, 8], strides = [1, 1]} : vector<64x8xf32> to vector<8x8xf32>
    %385 = vector.extract_strided_slice %324 {offsets = [0, 64], sizes = [8, 8], strides = [1, 1]} : vector<16x96xf32> to vector<8x8xf32>
    %cst_70 = arith.constant dense<0.000000e+00> : vector<8x8xf32>
    %386 = tpu.matmul %384, %385, %cst_70 {dimension_numbers = #tpu.dot_dimension_numbers<[1], [0], [0], [1], [0, 0, 1, 1], [], []>} : vector<8x8xf32>, vector<8x8xf32>, vector<8x8xf32> -> vector<8x8xf32>
    %387 = vector.extract_strided_slice %383 {offsets = [8, 0], sizes = [8, 8], strides = [1, 1]} : vector<64x8xf32> to vector<8x8xf32>
    %388 = vector.extract_strided_slice %324 {offsets = [0, 72], sizes = [8, 8], strides = [1, 1]} : vector<16x96xf32> to vector<8x8xf32>
    %cst_71 = arith.constant dense<0.000000e+00> : vector<8x8xf32>
    %389 = tpu.matmul %387, %388, %cst_71 {dimension_numbers = #tpu.dot_dimension_numbers<[1], [0], [0], [1], [0, 0, 1, 1], [], []>} : vector<8x8xf32>, vector<8x8xf32>, vector<8x8xf32> -> vector<8x8xf32>
    %390 = vector.extract_strided_slice %383 {offsets = [16, 0], sizes = [8, 8], strides = [1, 1]} : vector<64x8xf32> to vector<8x8xf32>
    %391 = vector.extract_strided_slice %324 {offsets = [0, 80], sizes = [8, 8], strides = [1, 1]} : vector<16x96xf32> to vector<8x8xf32>
    %cst_72 = arith.constant dense<0.000000e+00> : vector<8x8xf32>
    %392 = tpu.matmul %390, %391, %cst_72 {dimension_numbers = #tpu.dot_dimension_numbers<[1], [0], [0], [1], [0, 0, 1, 1], [], []>} : vector<8x8xf32>, vector<8x8xf32>, vector<8x8xf32> -> vector<8x8xf32>
    %393 = vector.extract_strided_slice %383 {offsets = [24, 0], sizes = [8, 8], strides = [1, 1]} : vector<64x8xf32> to vector<8x8xf32>
    %394 = vector.extract_strided_slice %324 {offsets = [0, 88], sizes = [8, 8], strides = [1, 1]} : vector<16x96xf32> to vector<8x8xf32>
    %cst_73 = arith.constant dense<0.000000e+00> : vector<8x8xf32>
    %395 = tpu.matmul %393, %394, %cst_73 {dimension_numbers = #tpu.dot_dimension_numbers<[1], [0], [0], [1], [0, 0, 1, 1], [], []>} : vector<8x8xf32>, vector<8x8xf32>, vector<8x8xf32> -> vector<8x8xf32>
    %396 = tpu.concatenate %386, %389, %392, %395 in 1 : vector<8x8xf32>, vector<8x8xf32>, vector<8x8xf32>, vector<8x8xf32> -> vector<8x32xf32>
    %397 = vector.extract_strided_slice %383 {offsets = [32, 0], sizes = [8, 8], strides = [1, 1]} : vector<64x8xf32> to vector<8x8xf32>
    %398 = vector.extract_strided_slice %324 {offsets = [8, 64], sizes = [8, 8], strides = [1, 1]} : vector<16x96xf32> to vector<8x8xf32>
    %cst_74 = arith.constant dense<0.000000e+00> : vector<8x8xf32>
    %399 = tpu.matmul %397, %398, %cst_74 {dimension_numbers = #tpu.dot_dimension_numbers<[1], [0], [0], [1], [0, 0, 1, 1], [], []>} : vector<8x8xf32>, vector<8x8xf32>, vector<8x8xf32> -> vector<8x8xf32>
    %400 = vector.extract_strided_slice %383 {offsets = [40, 0], sizes = [8, 8], strides = [1, 1]} : vector<64x8xf32> to vector<8x8xf32>
    %401 = vector.extract_strided_slice %324 {offsets = [8, 72], sizes = [8, 8], strides = [1, 1]} : vector<16x96xf32> to vector<8x8xf32>
    %cst_75 = arith.constant dense<0.000000e+00> : vector<8x8xf32>
    %402 = tpu.matmul %400, %401, %cst_75 {dimension_numbers = #tpu.dot_dimension_numbers<[1], [0], [0], [1], [0, 0, 1, 1], [], []>} : vector<8x8xf32>, vector<8x8xf32>, vector<8x8xf32> -> vector<8x8xf32>
    %403 = vector.extract_strided_slice %383 {offsets = [48, 0], sizes = [8, 8], strides = [1, 1]} : vector<64x8xf32> to vector<8x8xf32>
    %404 = vector.extract_strided_slice %324 {offsets = [8, 80], sizes = [8, 8], strides = [1, 1]} : vector<16x96xf32> to vector<8x8xf32>
    %cst_76 = arith.constant dense<0.000000e+00> : vector<8x8xf32>
    %405 = tpu.matmul %403, %404, %cst_76 {dimension_numbers = #tpu.dot_dimension_numbers<[1], [0], [0], [1], [0, 0, 1, 1], [], []>} : vector<8x8xf32>, vector<8x8xf32>, vector<8x8xf32> -> vector<8x8xf32>
    %406 = vector.extract_strided_slice %383 {offsets = [56, 0], sizes = [8, 8], strides = [1, 1]} : vector<64x8xf32> to vector<8x8xf32>
    %407 = vector.extract_strided_slice %324 {offsets = [8, 88], sizes = [8, 8], strides = [1, 1]} : vector<16x96xf32> to vector<8x8xf32>
    %cst_77 = arith.constant dense<0.000000e+00> : vector<8x8xf32>
    %408 = tpu.matmul %406, %407, %cst_77 {dimension_numbers = #tpu.dot_dimension_numbers<[1], [0], [0], [1], [0, 0, 1, 1], [], []>} : vector<8x8xf32>, vector<8x8xf32>, vector<8x8xf32> -> vector<8x8xf32>
    %409 = tpu.concatenate %399, %402, %405, %408 in 1 : vector<8x8xf32>, vector<8x8xf32>, vector<8x8xf32>, vector<8x8xf32> -> vector<8x32xf32>
    %410 = tpu.concatenate %396, %409 in 0 : vector<8x32xf32>, vector<8x32xf32> -> vector<16x32xf32>
    %c0_78 = arith.constant 0 : index
    %c0_79 = arith.constant 0 : index
    %411 = vector.load %arg9[%c0_78, %c0_79] : memref<32x32xf32, #tpu.memory_space<vmem>>, vector<32x32xf32>
    %cst_80 = arith.constant dense<0.000000e+00> : vector<16x32xf32>
    %412 = tpu.matmul %410, %411, %cst_80 {dimension_numbers = #tpu.dot_dimension_numbers<[1], [0], [0], [1], [0, 0, 1, 1], [], []>} : vector<16x32xf32>, vector<32x32xf32>, vector<16x32xf32> -> vector<16x32xf32>
    %c0_81 = arith.constant 0 : index
    %c0_82 = arith.constant 0 : index
    %413 = vector.load %arg10[%c0_81, %c0_82] : memref<1x32xf32, #tpu.memory_space<vmem>>, vector<1x32xf32>
    %414 = vector.broadcast %413 : vector<1x32xf32> to vector<16x32xf32>
    %415 = arith.addf %412, %414 : vector<16x32xf32>
    %416 = arith.mulf %319, %415 : vector<16x32xf32>
    %c0_83 = arith.constant 0 : index
    %c0_84 = arith.constant 0 : index
    %417 = vector.load %arg11[%c0_83, %c0_84] : memref<8x32xf32, #tpu.memory_space<vmem>>, vector<8x32xf32>
    %418 = vector.extract_strided_slice %416 {offsets = [0, 0], sizes = [8, 32], strides = [1, 1]} : vector<16x32xf32> to vector<8x32xf32>
    %419 = arith.mulf %418, %417 : vector<8x32xf32>
    %cst_85 = arith.constant dense<0.000000e+00> : vector<32xf32>
    %420 = vector.multi_reduction <add>, %419, %cst_85 [0] : vector<8x32xf32> to vector<32xf32>
    %421 = vector.shape_cast %420 : vector<32xf32> to vector<1x32xf32>
    %422 = vector.extract_strided_slice %416 {offsets = [8, 0], sizes = [8, 32], strides = [1, 1]} : vector<16x32xf32> to vector<8x32xf32>
    %423 = arith.mulf %422, %417 : vector<8x32xf32>
    %cst_86 = arith.constant dense<0.000000e+00> : vector<32xf32>
    %424 = vector.multi_reduction <add>, %423, %cst_86 [0] : vector<8x32xf32> to vector<32xf32>
    %425 = vector.shape_cast %424 : vector<32xf32> to vector<1x32xf32>
    %426 = tpu.concatenate %421, %425 in 0 : vector<1x32xf32>, vector<1x32xf32> -> vector<2x32xf32>
    %cst_87 = arith.constant dense<0.000000e+00> : vector<2xf32>
    %427 = vector.multi_reduction <add>, %426, %cst_87 [1] : vector<2x32xf32> to vector<2xf32>
    %428 = vector.shape_cast %427 : vector<2xf32> to vector<2x1xf32>
    %c0_88 = arith.constant 0 : index
    %c0_89 = arith.constant 0 : index
    %429 = vector.load %arg12[%c0_88, %c0_89] : memref<1x1xf32, #tpu.memory_space<vmem>>, vector<1x1xf32>
    %430 = vector.broadcast %429 : vector<1x1xf32> to vector<2x1xf32>
    %431 = arith.addf %428, %430 : vector<2x1xf32>
    %c0_90 = arith.constant 0 : index
    %c0_91 = arith.constant 0 : index
    %432 = vector.load %arg13[%c0_90, %c0_91] : memref<2x1xf32, #tpu.memory_space<vmem>>, vector<2x1xf32>
    tpu.vector_store %arg13[%c0_90, %c0_91], %431 {strides = array<i32>} : memref<2x1xf32, #tpu.memory_space<vmem>>, vector<2x1xf32>,
    return
  }
  func.func @transform_0(%arg0: i32) -> (i32, i32) {
    %c0_i32 = arith.constant 0 : i32
    %c0_i32_0 = arith.constant 0 : i32
    %c0_i32_1 = arith.constant 0 : i32
    return %c0_i32, %c0_i32_0 : i32, i32
  }
  func.func @transform_1(%arg0: i32) -> (i32, i32) {
    %c0_i32 = arith.constant 0 : i32
    %c0_i32_0 = arith.constant 0 : i32
    %c0_i32_1 = arith.constant 0 : i32
    return %c0_i32, %c0_i32_0 : i32, i32
  }
  func.func @transform_2(%arg0: i32) -> (i32, i32) {
    %c0_i32 = arith.constant 0 : i32
    %c0_i32_0 = arith.constant 0 : i32
    %c0_i32_1 = arith.constant 0 : i32
    return %c0_i32, %c0_i32_0 : i32, i32
  }
  func.func @transform_3(%arg0: i32) -> (i32, i32) {
    %c0_i32 = arith.constant 0 : i32
    %c0_i32_0 = arith.constant 0 : i32
    %c0_i32_1 = arith.constant 0 : i32
    return %c0_i32, %c0_i32_0 : i32, i32
  }
  func.func @transform_4(%arg0: i32) -> (i32, i32) {
    %c0_i32 = arith.constant 0 : i32
    %c0_i32_0 = arith.constant 0 : i32
    %c0_i32_1 = arith.constant 0 : i32
    return %c0_i32, %c0_i32_0 : i32, i32
  }
  func.func @transform_5(%arg0: i32) -> (i32, i32) {
    %c0_i32 = arith.constant 0 : i32
    %c0_i32_0 = arith.constant 0 : i32
    %c0_i32_1 = arith.constant 0 : i32
    return %c0_i32, %c0_i32_0 : i32, i32
  }
  func.func @transform_6(%arg0: i32) -> (i32, i32) {
    %c0_i32 = arith.constant 0 : i32
    %c0_i32_0 = arith.constant 0 : i32
    %c0_i32_1 = arith.constant 0 : i32
    return %c0_i32, %c0_i32_0 : i32, i32
  }
  func.func @transform_7(%arg0: i32) -> (i32, i32) {
    %c0_i32 = arith.constant 0 : i32
    %c0_i32_0 = arith.constant 0 : i32
    %c0_i32_1 = arith.constant 0 : i32
    return %c0_i32, %c0_i32_0 : i32, i32
  }
  func.func @transform_8(%arg0: i32) -> (i32, i32) {
    %c0_i32 = arith.constant 0 : i32
    %c0_i32_0 = arith.constant 0 : i32
    %c0_i32_1 = arith.constant 0 : i32
    return %c0_i32, %c0_i32_0 : i32, i32
  }
  func.func @transform_9(%arg0: i32) -> (i32, i32) {
    %c0_i32 = arith.constant 0 : i32
    %c0_i32_0 = arith.constant 0 : i32
    %c0_i32_1 = arith.constant 0 : i32
    return %c0_i32, %c0_i32_0 : i32, i32
  }
  func.func @transform_10(%arg0: i32) -> (i32, i32) {
    %c0_i32 = arith.constant 0 : i32
    %c0_i32_0 = arith.constant 0 : i32
    %c0_i32_1 = arith.constant 0 : i32
    return %c0_i32, %c0_i32_0 : i32, i32
  }
  func.func @transform_11(%arg0: i32) -> (i32, i32) {
    %c0_i32 = arith.constant 0 : i32
    %c0_i32_0 = arith.constant 0 : i32
    %c0_i32_1 = arith.constant 0 : i32
    return %c0_i32, %c0_i32_0 : i32, i32
  }
  func.func @transform_12(%arg0: i32) -> (i32, i32) {
    %c0_i32 = arith.constant 0 : i32
    %c0_i32_0 = arith.constant 0 : i32
    %c0_i32_1 = arith.constant 0 : i32
    return %c0_i32, %c0_i32_0 : i32, i32
  }
}

</mosaic_0001>

<bundles_post_ra>
// kernel: lstm_attention_forward.1
= control target key start
LH: loop header
LB: loop body
LE: loop exit
PB: predicated region body
PF: predicated region fallthrough
CT: control target
= control target key end

     0   :  { %s3104_s0 = inlined_call_operand.vmem [shape: f32[16,16], index: 0, kind: input, shape index: {}]   ;;  %s3105_s1 = inlined_call_operand.hbm [shape: f32[16,128], index: 1, kind: input, shape index: {}]   ;;  %s3106_s2 = inlined_call_operand.vmem [shape: f32[32,128], index: 2, kind: input, shape index: {}]   ;;  %s3107_s3 = inlined_call_operand.hbm [shape: f32[1,128], index: 3, kind: input, shape index: {}]   ;;  %s3108_s4 = inlined_call_operand.hbm [shape: f32[64,128], index: 4, kind: input, shape index: {}]   ;;  %s3109_s5 = inlined_call_operand.hbm [shape: f32[1,128], index: 5, kind: input, shape index: {}]   ;;  %s3110_s6 = inlined_call_operand.hbm [shape: f32[32,96], index: 6, kind: input, shape index: {}]   ;;  %s3111_s7 = inlined_call_operand.hbm [shape: f32[1,96], index: 7, kind: input, shape index: {}]   ;;  %s3112_s8 = inlined_call_operand.hbm [shape: f32[32,32], index: 8, kind: input, shape index: {}]   ;;  %s3113_s9 = inlined_call_operand.hbm [shape: f32[1,32], index: 9, kind: input, shape index: {}]   ;;  %s3114_s10 = inlined_call_operand.vmem [shape: f32[8,32], index: 10, kind: input, shape index: {}]   ;;  %s3115_s11 = inlined_call_operand.<no memory space> [shape: f32[1,1], index: 11, kind: input, shape index: {}]   ;;  %s3116_s12 = inlined_call_operand.vmem [shape: f32[2,1], index: 12, kind: output, shape index: {}]  }
   0x1   :  { %v17_v0 = vstv %s3115_s11 }
   0x2   :  { %18 = vst [vmem:[#allocation2] sm:$0x1] %v17_v0 }
   0x3   :  { %19 = vsyncpa [#allocation4], 0 }
   0x4   :  { %20 = vsyncpa [#allocation6], 0 }
   0x5   :  { %21 = vsyncpa [#allocation9], 0 }
   0x6   :  { %22 = vsyncpa [#allocation12], 0  ;;  %s46_s25 = sshll.u32 %s3107_s3, 4  ;;  %s47_s25 = int_to_ptr.hbm [resolvable:$true] %s46_s25 }
   0x7   :  { %23 = vsyncpa [#allocation15], 0  ;;  %s2506_s26 = smov [#allocation5]   ;;  %s70_s30 = sshll.u32 %s3109_s5, 4  ;;  %s71_s30 = int_to_ptr.hbm [resolvable:$true] %s70_s30 }
   0x8   :  { %s48_s27 = sshll.u32 %s2506_s26, 4  ;;  %s2507_s11 = smov [#allocation8]   ;;  %s49_s27 = int_to_ptr.vmem [resolvable:$true] %s48_s27 }
   0x9   :  { %51 = dma.hbm_to_vmem [thread:$0]  %s47_s25, 16, %s49_s27, [#allocation6]  }
   0xa   :  { %s72_s13 = sshll.u32 %s2507_s11, 4  ;;  %s94_s16 = sshll.u32 %s3111_s7, 4  ;;  %s73_s13 = int_to_ptr.vmem [resolvable:$true] %s72_s13  ;;  %s95_s16 = int_to_ptr.hbm [resolvable:$true] %s94_s16 }
   0xb   :  { %75 = dma.hbm_to_vmem [thread:$0]  %s71_s30, 16, %s73_s13, [#allocation9]  }
   0xc   :  { %s30_s18 = sshll.u32 %s3105_s1, 4  ;;  %s2508_s19 = smov [#allocation11]   ;;  %s31_s18 = int_to_ptr.hbm [resolvable:$true] %s30_s18 }
   0xd   :  { %s96_s20 = sshll.u32 %s2508_s19, 4  ;;  %s2509_s5 = smov [#allocation3]   ;;  %s97_s20 = int_to_ptr.vmem [resolvable:$true] %s96_s20 }
   0xe   :  { %99 = dma.hbm_to_vmem [thread:$0]  %s95_s16, 16, %s97_s20, [#allocation12]  }
   0xf   :  { %s32_s21 = sshll.u32 %s2509_s5, 4  ;;  %s2510_s22 = smov 128   ;;  %s33_s21 = int_to_ptr.vmem [resolvable:$true] %s32_s21 }
  0x10   :  { %s2511_s23 = smov 8   ;;  %s56_s25 = sshll.u32 %s3108_s4, 4  ;;  %s57_s25 = int_to_ptr.hbm [resolvable:$true] %s56_s25 }
  0x11   :  { %38 = dma.hbm_to_vmem [thread:$0]  %s31_s18, 256, %s33_s21, [#allocation4], %s2510_s22, %s2510_s22, %s2511_s23  }
  0x12   :  { %s2512_s26 = smov [#allocation7]   ;;  %s80_s29 = sshll.u32 %s3110_s6, 4  ;;  %s81_s29 = int_to_ptr.hbm [resolvable:$true] %s80_s29 }
  0x13   :  { %s58_s27 = sshll.u32 %s2512_s26, 4  ;;  %s2513_s30 = smov [#allocation10]   ;;  %s59_s27 = int_to_ptr.vmem [resolvable:$true] %s58_s27 }
  0x14   :  { %64 = dma.hbm_to_vmem [thread:$0]  %s57_s25, 1024, %s59_s27, [#allocation6], %s2510_s22, %s2510_s22, %s2511_s23  }
  0x15   :  { %s82_s11 = sshll.u32 %s2513_s30, 4  ;;  %s104_s15 = sshll.u32 %s3112_s8, 4  ;;  %s83_s11 = int_to_ptr.vmem [resolvable:$true] %s82_s11  ;;  %s105_s15 = int_to_ptr.hbm [resolvable:$true] %s104_s15 }
  0x16   :  { %88 = dma.hbm_to_vmem [thread:$0]  %s81_s29, 512, %s83_s11, [#allocation9], %s2510_s22, %s2510_s22, %s2511_s23  }
  0x17   :  { %s118_s3 = sshll.u32 %s3113_s9, 4  ;;  %s2514_s17 = smov [#allocation13]   ;;  %s119_s3 = int_to_ptr.hbm [resolvable:$true] %s118_s3 }
  0x18   :  { %s106_s18 = sshll.u32 %s2514_s17, 4  ;;  %s2515_s6 = smov [#allocation14]   ;;  %s107_s18 = int_to_ptr.vmem [resolvable:$true] %s106_s18 }
  0x19   :  { %112 = dma.hbm_to_vmem [thread:$0]  %s105_s15, 512, %s107_s18, [#allocation12], %s2510_s22, %s2510_s22, %s2511_s23  }
  0x1a   :  { %s120_s19 = sshll.u32 %s2515_s6, 4  ;;  %s121_s19 = int_to_ptr.vmem [resolvable:$true] %s120_s19 }
  0x1b   :  { %123 = dma.hbm_to_vmem [thread:$0]  %s119_s3, 16, %s121_s19, [#allocation15]  }
  0x1c   :  { %2496 = dma.done.wait [#allocation4], 256  }
  0x1d   :  { %2497 = vsyncadd [#allocation4], 4294967040 }
  0x1e   :  { %2498 = dma.done.wait [#allocation6], 1040  }
  0x1f   :  { %2499 = vsyncadd [#allocation6], 4294966256 }
  0x20   :  { %2500 = dma.done.wait [#allocation9], 528  }
  0x21   :  { %2501 = vsyncadd [#allocation9], 4294966768 }
  0x22   :  { %2502 = dma.done.wait [#allocation12], 528  }
  0x23   :  { %2503 = vsyncadd [#allocation12], 4294966768 }
  0x24   :  { %2504 = dma.done.wait [#allocation15], 16  }
  0x25   :  { %2505 = vsyncadd [#allocation15], 4294967280  ;;  %v2630_v1 = vld [vmem:[%s3106_s2 + $0x18] sm:$0xff]  ;;  %v179_v2 = vld [vmem:[#allocation3 + $0x8] sm:$0xff]  ;;  %vm184_vm0 = vcmask 130048   ;;  %v2516_v8 = vmov 0.0  }
  0x26   :  { %v2635_v3 = vld [vmem:[%s3106_s2 + $0x10] sm:$0xff]  ;;  %230 = vmatpush.msra.mxu1 %v2630_v1  ;;  %205 = vmatpush.msra.mxu0 %v179_v2  ;;  %v178_v4 = vld [vmem:[#allocation3] sm:$0xff]  ;;  %s2518_s27 = smov 32   ;;  %vm214_vm5 = vcmask 261120   ;;  %vm281_vm6 = vcmask 523264   ;;  %s2520_s29 = smov 96  }
  0x27   :  { %v176_v5 = vld [vmem:[%s3104_s0] sm:$0xff]  ;;  %v2644_v6 = vld [vmem:[%s3106_s2 + $0x8] sm:$0xff]  ;;  %356 = vmatpush.msra.mxu3 %v2630_v1  ;;  %v2667_v9 = vld [vmem:[#allocation5] ss:$0 sm:$0xff]  ;;  %s2521_s30 = smov 72   ;;  %s2522_s11 = smov 120  }
  0x28   :  { %231 = vmatpush.msra.mxu1 %v2635_v3  ;;  %206 = vmatpush.msra.mxu0 %v178_v4  ;;  %v2652_v7 = vld [vmem:[%s3106_s2] sm:$0xff]  ;;  %s2517_s2 = smov 64   ;;  %v2679_v34 = vld [vmem:[#allocation7 + $0x38] sm:$0xff]  ;;  %v2690_v37 = vld [vmem:[#allocation7 + $0x20] sm:$0xff]  ;;  %s2523_s13 = smov 88  }
  0x29   :  { %2052 = vmatmul.msk.f32.vlgmr.msra.gmra.mxu0 %vm184_vm0, %v176_v5  ;;  %357 = vmatpush.msra.mxu3 %v2635_v3  ;;  %v2681_v35 = vld [vmem:[#allocation7 + $0x30] sm:$0xff]  ;;  %v2685_v36 = vld [vmem:[#allocation7 + $0x28] sm:$0xff]  ;;  %v2695_v38 = vld [vmem:[#allocation7 + $0x18] sm:$0xff]  ;;  %s2524_s14 = smov 80   ;;  %s2525_s15 = smov 112  }
  0x2a   :  { %232 = vmatpush.msra.mxu1 %v2644_v6  ;;  %293 = vmatpush.msra.mxu2 %v2679_v34  ;;  %v2700_v39 = vld [vmem:[#allocation7 + $0x10] sm:$0xff]  ;;  %v2705_v40 = vld [vmem:[#allocation7 + $0x8] sm:$0xff]  ;;  %v2715_v43 = vld [vmem:[#allocation7] sm:$0xff]  ;;  %s2526_s4 = smov 56   ;;  %s2527_s16 = smov 40  }
  0x2b   :  { %358 = vmatpush.msra.mxu3 %v2644_v6  ;;  %430 = vmatpush.msrb.mxu0 %v2679_v34  ;;  %v2747_v46 = vld [vmem:[#allocation8] ss:$0 sm:$0xff]  ;;  %s2528_s3 = smov 48   ;;  %s2529_s17 = smov 16  }
  0x2c   :  { %233 = vmatpush.msra.mxu1 %v2652_v7  ;;  %294 = vmatpush.msra.mxu2 %v2681_v35  ;;  %s2530_s18 = smov 24  }
  0x2d   :  { %234 = vmatmul.f32.vlgmr.msra.gmra.mxu1 %v2516_v8  ;;  %359 = vmatpush.msra.mxu3 %v2652_v7 }
  0x2e   :  { %496 = vmatpush.msrb.mxu1 %v2630_v1  ;;  %431 = vmatpush.msrb.mxu0 %v2681_v35 }
  0x2f   :  { %570 = vmatpush.msrb.mxu3 %v2679_v34  ;;  %295 = vmatpush.msra.mxu2 %v2685_v36 }
  0x30   :  { %497 = vmatpush.msrb.mxu1 %v2635_v3  ;;  %432 = vmatpush.msrb.mxu0 %v2685_v36 }
  0x31   :  { %571 = vmatpush.msrb.mxu3 %v2681_v35  ;;  %296 = vmatpush.msra.mxu2 %v2690_v37 }
  0x32   :  { %498 = vmatpush.msrb.mxu1 %v2644_v6  ;;  %433 = vmatpush.msrb.mxu0 %v2690_v37 }
  0x33   :  { %572 = vmatpush.msrb.mxu3 %v2685_v36  ;;  %297 = vmatpush.msra.mxu2 %v2695_v38 }
  0x34   :  { %499 = vmatpush.msrb.mxu1 %v2652_v7  ;;  %434 = vmatpush.msrb.mxu0 %v2695_v38 }
  0x35   :  { %573 = vmatpush.msrb.mxu3 %v2690_v37  ;;  %298 = vmatpush.msra.mxu2 %v2700_v39 }
  0x36   :  { %636 = vmatpush.msra.mxu1 %v2630_v1  ;;  %435 = vmatpush.msrb.mxu0 %v2700_v39 }
  0x37   :  { %574 = vmatpush.msrb.mxu3 %v2695_v38  ;;  %299 = vmatpush.msra.mxu2 %v2705_v40 }
  0x38   :  { %637 = vmatpush.msra.mxu1 %v2635_v3  ;;  %436 = vmatpush.msrb.mxu0 %v2705_v40 }
  0x39   :  { %575 = vmatpush.msrb.mxu3 %v2700_v39  ;;  %300 = vmatpush.msra.mxu2 %v2715_v43 }
  0x3a   :  { %638 = vmatpush.msra.mxu1 %v2644_v6  ;;  %437 = vmatpush.msrb.mxu0 %v2715_v43 }
  0x3b   :  { %576 = vmatpush.msrb.mxu3 %v2705_v40  ;;  %710 = vmatpush.msrb.mxu2 %v2679_v34 }
  0x3c   :  { %639 = vmatpush.msra.mxu1 %v2652_v7  ;;  %776 = vmatpush.msra.mxu0 %v2630_v1 }
  0x3d   :  { %577 = vmatpush.msrb.mxu3 %v2715_v43  ;;  %711 = vmatpush.msrb.mxu2 %v2681_v35 }
  0x3e   :  { %777 = vmatpush.msra.mxu0 %v2635_v3 }
  0x3f   :  { %712 = vmatpush.msrb.mxu2 %v2685_v36 }
  0x40   :  { %778 = vmatpush.msra.mxu0 %v2644_v6 }
  0x41   :  { %713 = vmatpush.msrb.mxu2 %v2690_v37 }
  0x42   :  { %779 = vmatpush.msra.mxu0 %v2652_v7 }
  0x43   :  { %714 = vmatpush.msrb.mxu2 %v2695_v38 }
  0x45   :  { %715 = vmatpush.msrb.mxu2 %v2700_v39 }
  0x47   :  { %716 = vmatpush.msrb.mxu2 %v2705_v40 }
  0x49   :  { %717 = vmatpush.msrb.mxu2 %v2715_v43 }
  0xa6   :  { %v208_v10 = vpop.f32.mrf.mxu0 }
  0xa7   :  { %v2670_v11 = vadd.f32 %v2667_v9, %v208_v10 }
  0xaa   :  { %v235_v12 = vpop.f32.mrf.mxu1 }
  0xab   :  { %v238_v13 = vadd.f32 %v235_v12, %v2670_v11 }
  0xad   :  { %2143 = vtanh.f32 %v238_v13  ;;  %v2054_v15 = vmul.f32 -1.442695, %v238_v13 }
  0xaf   :  { %2145 = vpow2.f32 %v2054_v15 }
  0xb3   :  { %v2144_v14 = vpop.eup %2143 }
  0xb4   :  { %261 = vrot.lane.b32.xlu0 %v2144_v14, %s2517_s2 }
  0xb5   :  { %v2146_v16 = vpop.eup %2145 }
  0xb6   :  { %v242_v17 = vadd.f32 1.0, %v2146_v16 }
  0xb8   :  { %2147 = vrcp.f32 %v242_v17  ;;  %v254_v23 = vand.u32 2147483648, %v242_v17  ;;  %vm248_vm2 = vweird.f32 %v242_v17  ;;  %v252_v24 = vand.u32 2147483647, %v242_v17 }
  0xba   :  { %v255_v26 = vor.u32 1.1754944e-38, %v254_v23  ;;  %vm253_vm4 = vcmp.eq.f32.partialorder %v252_v24, 8.507059e+37 }
  0xbe   :  { %v2148_v18 = vpop.eup %2147 }
  0xbf   :  { %v244_v19 = vmul.f32 %v2148_v18, %v242_v17  ;;  %vm249_vm1 = vweird.f32 %v2148_v18 }
  0xc0   :  { %vm250_vm3 = vmor %vm248_vm2, %vm249_vm1 }
  0xc1   :  { %v245_v20 = vsub.f32 1.0, %v244_v19 }
  0xc3   :  { %v246_v21 = vmul.f32 %v2148_v18, %v245_v20 }
  0xc5   :  { %v247_v22 = vadd.f32 %v2148_v18, %v246_v21 }
  0xc7   :  { %v251_v25 = vsel %vm250_vm3, %v2148_v18, %v247_v22 }
  0xc8   :  { %v256_v28 = vsel %vm253_vm4, %v255_v26, %v251_v25 }
  0xc9   :  { %v259_v30 = vmul.f32 0.0, %v256_v28 }
 0x126   :  { %v262_v27 = vpop.permute.xlu0 %261 }
 0x127   :  { %v264_v29 = vmul.f32 %v262_v27, %v256_v28 }
 0x129   :  { %266 = vrot.lane.b32.xlu0 %v264_v29, %s2518_s27 }
 0x19b   :  { %v267_v31 = vpop.permute.xlu0 %266 }
 0x19c   :  { %v2675_v32 = vadd.f32 %v267_v31, %v259_v30 }
 0x19e   :  { %2149 = vtanh.f32 %v2675_v32  ;;  %v389_v29 = vrot.slane %v2675_v32, 6 }
 0x1a4   :  { %v2150_v33 = vpop.eup %2149 }
 0x1a5   :  { %272 = vrot.lane.b32.xlu1 %v2150_v33, %s2517_s2 }
 0x217   :  { %v273_v41 = vpop.permute.xlu1 %272 }
 0x218   :  { %v275_v42 = vmul.f32 %v273_v41, %v256_v28 }
 0x21a   :  { %277 = vrot.lane.b32.xlu1 %v275_v42, %s2518_s27 }
 0x28c   :  { %v278_v44 = vpop.permute.xlu1 %277 }
 0x28d   :  { %2057 = vmatmul.msk.f32.vlgmr.msra.gmra.mxu3 %vm214_vm5, %v278_v44  ;;  %v280_v45 = vsel %vm214_vm5, %v278_v44, 0.0 }
 0x28e   :  { %2055 = vmatmul.msk.f32.vlgmr.msra.gmra.mxu2 %vm281_vm6, %v280_v45  ;;  %1122 = vmatpush.msra.mxu3 %v2679_v34 }
 0x28f   :  { %1048 = vmatpush.msra.mxu2 %v2630_v1 }
 0x290   :  { %1123 = vmatpush.msra.mxu3 %v2681_v35 }
 0x291   :  { %1049 = vmatpush.msra.mxu2 %v2635_v3 }
 0x292   :  { %1124 = vmatpush.msra.mxu3 %v2685_v36 }
 0x293   :  { %1050 = vmatpush.msra.mxu2 %v2644_v6 }
 0x294   :  { %1125 = vmatpush.msra.mxu3 %v2690_v37 }
 0x295   :  { %1051 = vmatpush.msra.mxu2 %v2652_v7 }
 0x296   :  { %1126 = vmatpush.msra.mxu3 %v2695_v38 }
 0x298   :  { %1127 = vmatpush.msra.mxu3 %v2700_v39 }
 0x29a   :  { %1128 = vmatpush.msra.mxu3 %v2705_v40 }
 0x29c   :  { %1129 = vmatpush.msra.mxu3 %v2715_v43 }
 0x310   :  { %v361_v47 = vpop.f32.mrf.mxu3 }
 0x311   :  { %v302_v48 = vpop.f32.mrf.mxu2  ;;  %v365_v50 = vrot.slane %v361_v47, 6 }
 0x312   :  { %v303_v49 = vadd.f32 %v2747_v46, %v302_v48 }
 0x313   :  { %v367_v51 = vadd.f32 %v365_v50, %v2670_v11  ;;  %v177_v50 = vld [vmem:[%s3104_s0 + $0x8] sm:$0xff]  ;;  %s2519_s0 = smov 104  }
 0x314   :  { %2151 = vtanh.f32 %v303_v49  ;;  %v2056_v54 = vmul.f32 -1.442695, %v303_v49  ;;  %2053 = vmatmul.msk.f32.gmra.mxu0 %vm184_vm0, %v177_v50 }
 0x315   :  { %2153 = vtanh.f32 %v367_v51  ;;  %v2058_v55 = vmul.f32 -1.442695, %v367_v51 }
 0x316   :  { %2155 = vpow2.f32 %v2056_v54 }
 0x317   :  { %2157 = vpow2.f32 %v2058_v55 }
 0x31a   :  { %v2152_v52 = vpop.eup %2151 }
 0x31b   :  { %327 = vrot.lane.b32.xlu2 %v2152_v52, %s2517_s2  ;;  %v2154_v53 = vpop.eup %2153 }
 0x31c   :  { %v2156_v56 = vpop.eup %2155 }
 0x31d   :  { %v308_v57 = vadd.f32 1.0, %v2156_v56  ;;  %v2158_v58 = vpop.eup %2157 }
 0x31e   :  { %v371_v59 = vadd.f32 1.0, %v2158_v58 }
 0x31f   :  { %2159 = vrcp.f32 %v308_v57  ;;  %v320_v8 = vand.u32 2147483648, %v308_v57  ;;  %vm314_vm8 = vweird.f32 %v308_v57  ;;  %v318_v10 = vand.u32 2147483647, %v308_v57 }
 0x320   :  { %2161 = vrcp.f32 %v371_v59  ;;  %v383_v19 = vand.u32 2147483648, %v371_v59  ;;  %vm377_vm12 = vweird.f32 %v371_v59  ;;  %v381_v20 = vand.u32 2147483647, %v371_v59 }
 0x321   :  { %v321_v14 = vor.u32 1.1754944e-38, %v320_v8  ;;  %vm319_vm10 = vcmp.eq.f32.partialorder %v318_v10, 8.507059e+37 }
 0x322   :  { %v384_v22 = vor.u32 1.1754944e-38, %v383_v19  ;;  %vm382_vm14 = vcmp.eq.f32.partialorder %v381_v20, 8.507059e+37 }
 0x323   :  { %393 = vrot.lane.b32.xlu2 %v2154_v53, %s2517_s2 }
 0x325   :  { %v2160_v60 = vpop.eup %2159 }
 0x326   :  { %v310_v61 = vmul.f32 %v2160_v60, %v308_v57  ;;  %v2162_v63 = vpop.eup %2161  ;;  %vm315_vm7 = vweird.f32 %v2160_v60 }
 0x327   :  { %v373_v2 = vmul.f32 %v2162_v63, %v371_v59  ;;  %vm316_vm9 = vmor %vm314_vm8, %vm315_vm7  ;;  %vm378_vm11 = vweird.f32 %v2162_v63 }
 0x328   :  { %v311_v62 = vsub.f32 1.0, %v310_v61  ;;  %vm379_vm13 = vmor %vm377_vm12, %vm378_vm11 }
 0x329   :  { %v374_v5 = vsub.f32 1.0, %v373_v2 }
 0x32a   :  { %v312_v0 = vmul.f32 %v2160_v60, %v311_v62 }
 0x32b   :  { %v375_v13 = vmul.f32 %v2162_v63, %v374_v5 }
 0x32c   :  { %v313_v4 = vadd.f32 %v2160_v60, %v312_v0 }
 0x32d   :  { %v376_v18 = vadd.f32 %v2162_v63, %v375_v13 }
 0x32e   :  { %v317_v12 = vsel %vm316_vm9, %v2160_v60, %v313_v4 }
 0x32f   :  { %v322_v16 = vsel %vm319_vm10, %v321_v14, %v317_v12  ;;  %v380_v21 = vsel %vm379_vm13, %v2162_v63, %v376_v18 }
 0x330   :  { %v385_v23 = vsel %vm382_vm14, %v384_v22, %v380_v21  ;;  %v325_v26 = vmul.f32 0.0, %v322_v16 }
 0x331   :  { %v391_v30 = vmul.f32 %v389_v29, %v385_v23 }
 0x375   :  { %v328_v15 = vpop.permute.xlu2 %327 }
 0x376   :  { %v330_v17 = vmul.f32 %v328_v15, %v322_v16 }
 0x378   :  { %332 = vrot.lane.b32.xlu0 %v330_v17, %s2518_s27 }
 0x37d   :  { %v394_v24 = vpop.permute.xlu2 %393 }
 0x37e   :  { %v396_v25 = vmul.f32 %v394_v24, %v385_v23 }
 0x380   :  { %398 = vrot.lane.b32.xlu1 %v396_v25, %s2518_s27 }
 0x391   :  { %v2789_v56 = vpop.f32.mrf.mxu0 }
 0x3ea   :  { %v333_v27 = vpop.permute.xlu0 %332 }
 0x3eb   :  { %v2755_v28 = vadd.f32 %v333_v27, %v325_v26 }
 0x3ed   :  { %2163 = vtanh.f32 %v2755_v28 }
 0x3f2   :  { %v399_v31 = vpop.permute.xlu1 %398 }
 0x3f3   :  { %v2164_v33 = vpop.eup %2163  ;;  %v2759_v41 = vadd.f32 %v399_v31, %v391_v30 }
 0x3f4   :  { %338 = vrot.lane.b32.xlu2 %v2164_v33, %s2517_s2 }
 0x3f5   :  { %2165 = vtanh.f32 %v2759_v41 }
 0x3fb   :  { %v2166_v42 = vpop.eup %2165 }
 0x3fc   :  { %404 = vrot.lane.b32.xlu0 %v2166_v42, %s2517_s2 }
 0x44e   :  { %v339_v44 = vpop.permute.xlu2 %338 }
 0x44f   :  { %v2764_v45 = vmul.f32 %v339_v44, %v322_v16 }
 0x451   :  { %v413_v47 = vrot.slane %v2764_v45, 6 }
 0x453   :  { %414 = vrot.lane.b32.xlu2 %v413_v47, %s2517_s2 }
 0x46e   :  { %v405_v32 = vpop.permute.xlu0 %404 }
 0x46f   :  { %v407_v48 = vmul.f32 %v405_v32, %v385_v23 }
 0x471   :  { %v479_v49 = vrot.slane %v407_v48, 2  ;;  %409 = vrot.lane.b32.xlu1 %v407_v48, %s2518_s27  ;;  %v529_v48 = vrot.slane %v2759_v41, 6 }
 0x473   :  { %480 = vrot.lane.b32.xlu0 %v479_v49, %s2518_s27 }
 0x4ad   :  { %v415_v51 = vpop.permute.xlu2 %414 }
 0x4e3   :  { %v410_v52 = vpop.permute.xlu1 %409 }
 0x4e4   :  { %v417_v53 = vsel %vm214_vm5, %v410_v52, %v415_v51 }
 0x4e5   :  { %v419_v54 = vrot.slane %v417_v53, 2  ;;  %v481_v55 = vpop.permute.xlu0 %480 }
 0x4e6   :  { %2061 = vmatmul.msk.f32.vlgmr.msrb.gmra.mxu1 %vm214_vm5, %v481_v55 }
 0x4e7   :  { %2059 = vmatmul.msk.f32.vlgmr.msrb.gmra.mxu0 %vm281_vm6, %v419_v54  ;;  %845 = vmatpush.msrb.mxu1 %v2679_v34 }
 0x4e8   :  { %908 = vmatpush.msrb.mxu0 %v2630_v1 }
 0x4e9   :  { %846 = vmatpush.msrb.mxu1 %v2681_v35 }
 0x4ea   :  { %909 = vmatpush.msrb.mxu0 %v2635_v3 }
 0x4eb   :  { %847 = vmatpush.msrb.mxu1 %v2685_v36 }
 0x4ec   :  { %910 = vmatpush.msrb.mxu0 %v2644_v6 }
 0x4ed   :  { %848 = vmatpush.msrb.mxu1 %v2690_v37 }
 0x4ee   :  { %911 = vmatpush.msrb.mxu0 %v2652_v7 }
 0x4ef   :  { %849 = vmatpush.msrb.mxu1 %v2695_v38 }
 0x4f1   :  { %850 = vmatpush.msrb.mxu1 %v2700_v39 }
 0x4f3   :  { %851 = vmatpush.msrb.mxu1 %v2705_v40 }
 0x4f5   :  { %852 = vmatpush.msrb.mxu1 %v2715_v43 }
 0x563   :  { %v501_v57 = vpop.f32.mrf.mxu1 }
 0x564   :  { %v505_v58 = vrot.slane %v501_v57, 4  ;;  %v439_v59 = vpop.f32.mrf.mxu0 }
 0x565   :  { %v440_v60 = vadd.f32 %v2747_v46, %v439_v59 }
 0x566   :  { %v507_v61 = vadd.f32 %v505_v58, %v2670_v11 }
 0x567   :  { %2167 = vtanh.f32 %v440_v60  ;;  %v2060_v8 = vmul.f32 -1.442695, %v440_v60 }
 0x568   :  { %2169 = vtanh.f32 %v507_v61  ;;  %v2062_v0 = vmul.f32 -1.442695, %v507_v61 }
 0x56a   :  { %2171 = vpow2.f32 %v2062_v0 }
 0x56d   :  { %v2168_v62 = vpop.eup %2167 }
 0x56e   :  { %v2170_v63 = vpop.eup %2169  ;;  %464 = vrot.lane.b32.xlu1 %v2168_v62, %s2517_s2 }
 0x56f   :  { %533 = vrot.lane.b32.xlu2 %v2170_v63, %s2517_s2 }
 0x570   :  { %v2172_v2 = vpop.eup %2171 }
 0x571   :  { %v511_v4 = vadd.f32 1.0, %v2172_v2 }
 0x573   :  { %2173 = vrcp.f32 %v511_v4  ;;  %v523_v17 = vand.u32 2147483648, %v511_v4  ;;  %vm517_vm1 = vweird.f32 %v511_v4  ;;  %v521_v18 = vand.u32 2147483647, %v511_v4 }
 0x574   :  { %2175 = vpow2.f32 %v2060_v8 }
 0x575   :  { %v524_v20 = vor.u32 1.1754944e-38, %v523_v17  ;;  %vm522_vm3 = vcmp.eq.f32.partialorder %v521_v18, 8.507059e+37 }
 0x579   :  { %v2174_v5 = vpop.eup %2173 }
 0x57a   :  { %v513_v10 = vmul.f32 %v2174_v5, %v511_v4  ;;  %v2176_v13 = vpop.eup %2175  ;;  %vm518_vm15 = vweird.f32 %v2174_v5 }
 0x57b   :  { %v445_v15 = vadd.f32 1.0, %v2176_v13  ;;  %vm519_vm2 = vmor %vm517_vm1, %vm518_vm15 }
 0x57c   :  { %v514_v12 = vsub.f32 1.0, %v513_v10 }
 0x57d   :  { %2177 = vrcp.f32 %v445_v15  ;;  %v457_v30 = vand.u32 2147483648, %v445_v15  ;;  %vm451_vm7 = vweird.f32 %v445_v15  ;;  %v455_v31 = vand.u32 2147483647, %v445_v15 }
 0x57e   :  { %v515_v14 = vmul.f32 %v2174_v5, %v514_v12 }
 0x57f   :  { %v458_v42 = vor.u32 1.1754944e-38, %v457_v30  ;;  %vm456_vm9 = vcmp.eq.f32.partialorder %v455_v31, 8.507059e+37 }
 0x580   :  { %v516_v16 = vadd.f32 %v2174_v5, %v515_v14 }
 0x582   :  { %v520_v19 = vsel %vm519_vm2, %v2174_v5, %v516_v16 }
 0x583   :  { %v525_v21 = vsel %vm522_vm3, %v524_v20, %v520_v19  ;;  %v2178_v23 = vpop.eup %2177  ;;  %vm1338_vm3 = vcmask 1040384  }
 0x584   :  { %v447_v25 = vmul.f32 %v2178_v23, %v445_v15  ;;  %vm452_vm4 = vweird.f32 %v2178_v23  ;;  %v531_v49 = vmul.f32 %v529_v48, %v525_v21 }
 0x585   :  { %vm453_vm8 = vmor %vm451_vm7, %vm452_vm4  ;;  %vm1340_vm4 = vcmask 1041408  }
 0x586   :  { %v448_v26 = vsub.f32 1.0, %v447_v25 }
 0x588   :  { %v449_v27 = vmul.f32 %v2178_v23, %v448_v26 }
 0x58a   :  { %v450_v29 = vadd.f32 %v2178_v23, %v449_v27 }
 0x58c   :  { %v454_v33 = vsel %vm453_vm8, %v2178_v23, %v450_v29 }
 0x58d   :  { %v459_v47 = vsel %vm456_vm9, %v458_v42, %v454_v33 }
 0x58e   :  { %v462_v53 = vmul.f32 %v459_v47, %v2755_v28 }
 0x5c9   :  { %v534_v22 = vpop.permute.xlu2 %533 }
 0x5ca   :  { %v536_v24 = vmul.f32 %v534_v22, %v525_v21 }
 0x5cc   :  { %538 = vrot.lane.b32.xlu1 %v536_v24, %s2518_s27 }
 0x5e0   :  { %v465_v44 = vpop.permute.xlu1 %464 }
 0x5e1   :  { %v467_v32 = vmul.f32 %v465_v44, %v459_v47 }
 0x5e3   :  { %469 = vrot.lane.b32.xlu0 %v467_v32, %s2518_s27 }
 0x63e   :  { %v539_v50 = vpop.permute.xlu1 %538 }
 0x63f   :  { %v2798_v51 = vadd.f32 %v539_v50, %v531_v49 }
 0x641   :  { %2179 = vtanh.f32 %v2798_v51 }
 0x647   :  { %v2180_v52 = vpop.eup %2179 }
 0x648   :  { %544 = vrot.lane.b32.xlu0 %v2180_v52, %s2517_s2 }
 0x655   :  { %v470_v54 = vpop.permute.xlu0 %469 }
 0x656   :  { %v2803_v55 = vadd.f32 %v470_v54, %v462_v53  ;;  %v669_v54 = vrot.slane %v2798_v51, 6 }
 0x658   :  { %2181 = vtanh.f32 %v2803_v55 }
 0x65e   :  { %v2182_v57 = vpop.eup %2181 }
 0x65f   :  { %475 = vrot.lane.b32.xlu2 %v2182_v57, %s2517_s2 }
 0x6b9   :  { %v476_v41 = vpop.permute.xlu2 %475 }
 0x6ba   :  { %v2807_v58 = vmul.f32 %v476_v41, %v459_v47  ;;  %v545_v59 = vpop.permute.xlu0 %544 }
 0x6bb   :  { %v547_v60 = vmul.f32 %v545_v59, %v525_v21 }
 0x6bc   :  { %v553_v61 = vrot.slane %v2807_v58, 4 }
 0x6bd   :  { %v619_v62 = vrot.slane %v547_v60, 4  ;;  %549 = vrot.lane.b32.xlu1 %v547_v60, %s2518_s27 }
 0x6be   :  { %554 = vrot.lane.b32.xlu2 %v553_v61, %s2517_s2 }
 0x6bf   :  { %620 = vrot.lane.b32.xlu0 %v619_v62, %s2518_s27 }
 0x718   :  { %v555_v28 = vpop.permute.xlu2 %554 }
 0x72f   :  { %v550_v63 = vpop.permute.xlu1 %549 }
 0x730   :  { %v557_v0 = vsel %vm214_vm5, %v550_v63, %v555_v28 }
 0x731   :  { %v559_v2 = vrot.slane %v557_v0, 4  ;;  %v621_v4 = vpop.permute.xlu0 %620 }
 0x732   :  { %2065 = vmatmul.msk.f32.vlgmr.msra.gmra.mxu1 %vm214_vm5, %v621_v4  ;;  %v1311_v4 = vrot.slane %v2807_v58, 7 }
 0x733   :  { %2063 = vmatmul.msk.f32.vlgmr.msrb.gmra.mxu3 %vm281_vm6, %v559_v2  ;;  %1188 = vmatpush.msra.mxu1 %v2630_v1 }
 0x735   :  { %1189 = vmatpush.msra.mxu1 %v2635_v3 }
 0x737   :  { %1190 = vmatpush.msra.mxu1 %v2644_v6 }
 0x739   :  { %1191 = vmatpush.msra.mxu1 %v2652_v7 }
 0x7af   :  { %v641_v5 = vpop.f32.mrf.mxu1 }
 0x7b0   :  { %v645_v8 = vrot.slane %v641_v5, 2 }
 0x7b2   :  { %v647_v10 = vadd.f32 %v645_v8, %v2670_v11  ;;  %v1325_v8 = vrot.slane %v2764_v45, 1 }
 0x7b4   :  { %2183 = vtanh.f32 %v647_v10  ;;  %v2066_v1 = vmul.f32 -1.442695, %v647_v10 }
 0x7b6   :  { %v579_v12 = vpop.f32.mrf.mxu3 }
 0x7b7   :  { %v580_v13 = vadd.f32 %v2747_v46, %v579_v12 }
 0x7b9   :  { %2185 = vtanh.f32 %v580_v13  ;;  %v2064_v17 = vmul.f32 -1.442695, %v580_v13 }
 0x7ba   :  { %v2184_v14 = vpop.eup %2183  ;;  %2187 = vpow2.f32 %v2066_v1 }
 0x7bb   :  { %673 = vrot.lane.b32.xlu2 %v2184_v14, %s2517_s2  ;;  %v1339_v14 = vsel %vm1338_vm3, %v2764_v45, %v1311_v4 }
 0x7bf   :  { %v2186_v15 = vpop.eup %2185 }
 0x7c0   :  { %604 = vrot.lane.b32.xlu1 %v2186_v15, %s2517_s2  ;;  %v2188_v3 = vpop.eup %2187  ;;  %v1352_v15 = vsel %vm1338_vm3, %v1325_v8, %v2807_v58 }
 0x7c1   :  { %v651_v6 = vadd.f32 1.0, %v2188_v3 }
 0x7c3   :  { %2189 = vrcp.f32 %v651_v6  ;;  %v663_v21 = vand.u32 2147483648, %v651_v6  ;;  %vm657_vm11 = vweird.f32 %v651_v6  ;;  %v661_v22 = vand.u32 2147483647, %v651_v6 }
 0x7c4   :  { %2191 = vpow2.f32 %v2064_v17 }
 0x7c5   :  { %v664_v25 = vor.u32 1.1754944e-38, %v663_v21  ;;  %vm662_vm13 = vcmp.eq.f32.partialorder %v661_v22, 8.507059e+37 }
 0x7c9   :  { %v2190_v7 = vpop.eup %2189 }
 0x7ca   :  { %v653_v16 = vmul.f32 %v2190_v7, %v651_v6  ;;  %vm658_vm10 = vweird.f32 %v2190_v7  ;;  %v2192_v20 = vpop.eup %2191 }
 0x7cb   :  { %vm659_vm12 = vmor %vm657_vm11, %vm658_vm10  ;;  %v585_v23 = vadd.f32 1.0, %v2192_v20 }
 0x7cc   :  { %v654_v11 = vsub.f32 1.0, %v653_v16 }
 0x7cd   :  { %2193 = vrcp.f32 %v585_v23  ;;  %v597_v47 = vand.u32 2147483648, %v585_v23  ;;  %vm591_vm15 = vweird.f32 %v585_v23  ;;  %v595_v32 = vand.u32 2147483647, %v585_v23 }
 0x7ce   :  { %v655_v18 = vmul.f32 %v2190_v7, %v654_v11 }
 0x7cf   :  { %v598_v49 = vor.u32 1.1754944e-38, %v597_v47  ;;  %vm596_vm2 = vcmp.eq.f32.partialorder %v595_v32, 8.507059e+37 }
 0x7d0   :  { %v656_v19 = vadd.f32 %v2190_v7, %v655_v18 }
 0x7d2   :  { %v660_v24 = vsel %vm659_vm12, %v2190_v7, %v656_v19 }
 0x7d3   :  { %v665_v26 = vsel %vm662_vm13, %v664_v25, %v660_v24  ;;  %v2194_v30 = vpop.eup %2193 }
 0x7d4   :  { %v587_v31 = vmul.f32 %v2194_v30, %v585_v23  ;;  %vm592_vm14 = vweird.f32 %v2194_v30  ;;  %v671_v57 = vmul.f32 %v669_v54, %v665_v26 }
 0x7d5   :  { %vm593_vm1 = vmor %vm591_vm15, %vm592_vm14  ;;  %vm1342_vm15 = vcmask 1042432  }
 0x7d6   :  { %v588_v33 = vsub.f32 1.0, %v587_v31 }
 0x7d8   :  { %v589_v42 = vmul.f32 %v2194_v30, %v588_v33 }
 0x7da   :  { %v590_v44 = vadd.f32 %v2194_v30, %v589_v42 }
 0x7dc   :  { %v594_v48 = vsel %vm593_vm1, %v2194_v30, %v590_v44 }
 0x7dd   :  { %v599_v52 = vsel %vm596_vm2, %v598_v49, %v594_v48 }
 0x7de   :  { %v602_v61 = vmul.f32 %v599_v52, %v2803_v55 }
 0x815   :  { %v674_v27 = vpop.permute.xlu2 %673 }
 0x816   :  { %v676_v29 = vmul.f32 %v674_v27, %v665_v26 }
 0x818   :  { %678 = vrot.lane.b32.xlu1 %v676_v29, %s2518_s27 }
 0x832   :  { %v605_v50 = vpop.permute.xlu1 %604 }
 0x833   :  { %v607_v53 = vmul.f32 %v605_v50, %v599_v52 }
 0x835   :  { %609 = vrot.lane.b32.xlu0 %v607_v53, %s2518_s27 }
 0x88a   :  { %v679_v41 = vpop.permute.xlu1 %678 }
 0x88b   :  { %v2827_v59 = vadd.f32 %v679_v41, %v671_v57 }
 0x88d   :  { %2195 = vtanh.f32 %v2827_v59 }
 0x893   :  { %v2196_v60 = vpop.eup %2195 }
 0x894   :  { %684 = vrot.lane.b32.xlu0 %v2196_v60, %s2517_s2 }
 0x8a7   :  { %v610_v62 = vpop.permute.xlu0 %609 }
 0x8a8   :  { %v2832_v28 = vadd.f32 %v610_v62, %v602_v61 }
 0x8aa   :  { %2197 = vtanh.f32 %v2832_v28 }
 0x8b0   :  { %v2198_v63 = vpop.eup %2197 }
 0x8b1   :  { %615 = vrot.lane.b32.xlu2 %v2198_v63, %s2517_s2  ;;  %v806_v63 = vrot.slane %v2827_v59, 6 }
 0x906   :  { %v685_v51 = vpop.permute.xlu0 %684 }
 0x907   :  { %v687_v0 = vmul.f32 %v685_v51, %v665_v26 }
 0x909   :  { %v759_v2 = vrot.slane %v687_v0, 6  ;;  %689 = vrot.lane.b32.xlu1 %v687_v0, %s2518_s27 }
 0x90b   :  { %760 = vrot.lane.b32.xlu0 %v759_v2, %s2518_s27  ;;  %v616_v5 = vpop.permute.xlu2 %615 }
 0x90c   :  { %v618_v55 = vmul.f32 %v616_v5, %v599_v52 }
 0x90e   :  { %v1313_v10 = vrot.slane %v618_v55, 6  ;;  %v1327_v12 = vrot.slane %v618_v55, 7  ;;  %v693_v13 = vrot.slane %v618_v55, 2 }
 0x910   :  { %v2844_v1 = vsel %vm1340_vm4, %v1339_v14, %v1313_v10  ;;  %v2846_v3 = vsel %vm1340_vm4, %v1352_v15, %v1327_v12  ;;  %694 = vrot.lane.b32.xlu2 %v693_v13, %s2517_s2 }
 0x96a   :  { %v695_v6 = vpop.permute.xlu2 %694 }
 0x97b   :  { %v690_v7 = vpop.permute.xlu1 %689 }
 0x97c   :  { %v697_v16 = vsel %vm214_vm5, %v690_v7, %v695_v6 }
 0x97d   :  { %v699_v17 = vrot.slane %v697_v16, 6  ;;  %v761_v11 = vpop.permute.xlu0 %760 }
 0x97e   :  { %2069 = vmatmul.msk.f32.vlgmr.msra.gmra.mxu0 %vm214_vm5, %v761_v11 }
 0x97f   :  { %2067 = vmatmul.msk.f32.vlgmr.msrb.gmra.mxu2 %vm281_vm6, %v699_v17  ;;  %982 = vmatpush.msra.mxu0 %v2679_v34 }
 0x980   :  { %1262 = vmatpush.msrb.mxu2 %v2679_v34  ;;  %v2870_v34 = vadd.f32 %v2667_v9, %v2789_v56 }
 0x981   :  { %983 = vmatpush.msra.mxu0 %v2681_v35 }
 0x982   :  { %1263 = vmatpush.msrb.mxu2 %v2681_v35 }
 0x983   :  { %984 = vmatpush.msra.mxu0 %v2685_v36 }
 0x984   :  { %1264 = vmatpush.msrb.mxu2 %v2685_v36 }
 0x985   :  { %985 = vmatpush.msra.mxu0 %v2690_v37 }
 0x986   :  { %1265 = vmatpush.msrb.mxu2 %v2690_v37 }
 0x987   :  { %986 = vmatpush.msra.mxu0 %v2695_v38 }
 0x988   :  { %1266 = vmatpush.msrb.mxu2 %v2695_v38 }
 0x989   :  { %987 = vmatpush.msra.mxu0 %v2700_v39 }
 0x98a   :  { %1267 = vmatpush.msrb.mxu2 %v2700_v39 }
 0x98b   :  { %988 = vmatpush.msra.mxu0 %v2705_v40 }
 0x98c   :  { %1268 = vmatpush.msrb.mxu2 %v2705_v40 }
 0x98d   :  { %989 = vmatpush.msra.mxu0 %v2715_v43 }
 0x98e   :  { %1269 = vmatpush.msrb.mxu2 %v2715_v43 }
 0x9fb   :  { %v781_v35 = vpop.f32.mrf.mxu0 }
 0x9fc   :  { %v784_v36 = vadd.f32 %v781_v35, %v2870_v34 }
 0x9fe   :  { %2199 = vtanh.f32 %v784_v36  ;;  %v2070_v9 = vmul.f32 -1.442695, %v784_v36 }
 0xa02   :  { %v719_v37 = vpop.f32.mrf.mxu2 }
 0xa03   :  { %v720_v38 = vadd.f32 %v2747_v46, %v719_v37 }
 0xa04   :  { %v2200_v39 = vpop.eup %2199 }
 0xa05   :  { %2201 = vtanh.f32 %v720_v38  ;;  %810 = vrot.lane.b32.xlu1 %v2200_v39, %s2517_s2  ;;  %v2068_v45 = vmul.f32 -1.442695, %v720_v38 }
 0xa07   :  { %2203 = vpow2.f32 %v2068_v45 }
 0xa0b   :  { %v2202_v40 = vpop.eup %2201 }
 0xa0c   :  { %744 = vrot.lane.b32.xlu2 %v2202_v40, %s2517_s2 }
 0xa0d   :  { %v2204_v43 = vpop.eup %2203 }
 0xa0e   :  { %v725_v58 = vadd.f32 1.0, %v2204_v43 }
 0xa10   :  { %2205 = vrcp.f32 %v725_v58  ;;  %v737_v24 = vand.u32 2147483648, %v725_v58  ;;  %vm731_vm8 = vweird.f32 %v725_v58  ;;  %v735_v26 = vand.u32 2147483647, %v725_v58 }
 0xa11   :  { %2207 = vpow2.f32 %v2070_v9 }
 0xa12   :  { %v738_v29 = vor.u32 1.1754944e-38, %v737_v24  ;;  %vm736_vm10 = vcmp.eq.f32.partialorder %v735_v26, 8.507059e+37 }
 0xa16   :  { %v2206_v56 = vpop.eup %2205 }
 0xa17   :  { %v727_v18 = vmul.f32 %v2206_v56, %v725_v58  ;;  %v2208_v19 = vpop.eup %2207  ;;  %vm732_vm7 = vweird.f32 %v2206_v56 }
 0xa18   :  { %v788_v20 = vadd.f32 1.0, %v2208_v19  ;;  %vm733_vm9 = vmor %vm731_vm8, %vm732_vm7 }
 0xa19   :  { %v728_v21 = vsub.f32 1.0, %v727_v18 }
 0xa1a   :  { %2209 = vrcp.f32 %v788_v20  ;;  %v800_v48 = vand.u32 2147483648, %v788_v20  ;;  %vm794_vm12 = vweird.f32 %v788_v20  ;;  %v798_v49 = vand.u32 2147483647, %v788_v20 }
 0xa1b   :  { %v729_v22 = vmul.f32 %v2206_v56, %v728_v21 }
 0xa1c   :  { %v801_v52 = vor.u32 1.1754944e-38, %v800_v48  ;;  %vm799_vm14 = vcmp.eq.f32.partialorder %v798_v49, 8.507059e+37 }
 0xa1d   :  { %v730_v23 = vadd.f32 %v2206_v56, %v729_v22 }
 0xa1f   :  { %v734_v27 = vsel %vm733_vm9, %v2206_v56, %v730_v23 }
 0xa20   :  { %v2210_v25 = vpop.eup %2209  ;;  %v739_v33 = vsel %vm736_vm10, %v738_v29, %v734_v27 }
 0xa21   :  { %v790_v30 = vmul.f32 %v2210_v25, %v788_v20  ;;  %vm795_vm11 = vweird.f32 %v2210_v25  ;;  %v742_v41 = vmul.f32 %v739_v33, %v2832_v28 }
 0xa22   :  { %vm796_vm13 = vmor %vm794_vm12, %vm795_vm11  ;;  %vm1344_vm12 = vcmask 1043456  }
 0xa23   :  { %v791_v44 = vsub.f32 1.0, %v790_v30 }
 0xa25   :  { %v792_v47 = vmul.f32 %v2210_v25, %v791_v44 }
 0xa27   :  { %v793_v32 = vadd.f32 %v2210_v25, %v792_v47 }
 0xa29   :  { %v797_v50 = vsel %vm796_vm13, %v2210_v25, %v793_v32 }
 0xa2a   :  { %v802_v54 = vsel %vm799_vm14, %v801_v52, %v797_v50 }
 0xa2b   :  { %v808_v51 = vmul.f32 %v806_v63, %v802_v54 }
 0xa66   :  { %v745_v31 = vpop.permute.xlu2 %744 }
 0xa67   :  { %v747_v42 = vmul.f32 %v745_v31, %v739_v33 }
 0xa69   :  { %749 = vrot.lane.b32.xlu1 %v747_v42, %s2518_s27 }
 0xa77   :  { %v811_v53 = vpop.permute.xlu1 %810 }
 0xa78   :  { %v813_v57 = vmul.f32 %v811_v53, %v802_v54 }
 0xa7a   :  { %815 = vrot.lane.b32.xlu0 %v813_v57, %s2518_s27 }
 0xadb   :  { %v750_v60 = vpop.permute.xlu1 %749 }
 0xadc   :  { %v2879_v61 = vadd.f32 %v750_v60, %v742_v41 }
 0xade   :  { %2211 = vtanh.f32 %v2879_v61 }
 0xae4   :  { %v2212_v62 = vpop.eup %2211 }
 0xae5   :  { %755 = vrot.lane.b32.xlu0 %v2212_v62, %s2517_s2 }
 0xaec   :  { %v816_v0 = vpop.permute.xlu0 %815 }
 0xaed   :  { %v2884_v2 = vadd.f32 %v816_v0, %v808_v51 }
 0xaef   :  { %2213 = vtanh.f32 %v2884_v2  ;;  %v941_v50 = vrot.slane %v2884_v2, 6 }
 0xaf5   :  { %v2214_v4 = vpop.eup %2213 }
 0xaf6   :  { %821 = vrot.lane.b32.xlu2 %v2214_v4, %s2517_s2 }
 0xb50   :  { %v822_v28 = vpop.permute.xlu2 %821 }
 0xb51   :  { %v824_v5 = vmul.f32 %v822_v28, %v802_v54 }
 0xb53   :  { %826 = vrot.lane.b32.xlu1 %v824_v5, %s2518_s27 }
 0xb57   :  { %v756_v55 = vpop.permute.xlu0 %755 }
 0xb58   :  { %v758_v8 = vmul.f32 %v756_v55, %v739_v33 }
 0xb5a   :  { %v1315_v10 = vrot.slane %v758_v8, 5  ;;  %v1329_v12 = vrot.slane %v758_v8, 6  ;;  %830 = vrot.lane.b32.xlu2 %v758_v8, %s2517_s2 }
 0xb5c   :  { %v2891_v59 = vsel %vm1342_vm15, %v2844_v1, %v1315_v10  ;;  %v2894_v13 = vsel %vm1342_vm15, %v2846_v3, %v1329_v12 }
 0xbb4   :  { %v831_v14 = vpop.permute.xlu2 %830 }
 0xbc5   :  { %v827_v15 = vpop.permute.xlu1 %826 }
 0xbc6   :  { %v833_v6 = vsel %vm214_vm5, %v827_v15, %v831_v14  ;;  %2073 = vmatmul.msk.f32.vlgmr.msrb.gmra.mxu0 %vm214_vm5, %v827_v15 }
 0xbc7   :  { %2071 = vmatmul.msk.f32.vlgmr.msrb.gmra.mxu1 %vm281_vm6, %v833_v6 }
 0xc43   :  { %v913_v7 = vpop.f32.mrf.mxu0 }
 0xc44   :  { %v917_v16 = vrot.slane %v913_v7, 6  ;;  %v854_v17 = vpop.f32.mrf.mxu1 }
 0xc45   :  { %v855_v11 = vadd.f32 %v2747_v46, %v854_v17 }
 0xc46   :  { %v919_v35 = vadd.f32 %v917_v16, %v2870_v34 }
 0xc47   :  { %2215 = vtanh.f32 %v855_v11  ;;  %v2072_v36 = vmul.f32 -1.442695, %v855_v11 }
 0xc48   :  { %2217 = vtanh.f32 %v919_v35  ;;  %v2074_v37 = vmul.f32 -1.442695, %v919_v35 }
 0xc49   :  { %2219 = vpow2.f32 %v2072_v36 }
 0xc4a   :  { %2221 = vpow2.f32 %v2074_v37 }
 0xc4d   :  { %v2216_v1 = vpop.eup %2215 }
 0xc4e   :  { %v2218_v3 = vpop.eup %2217  ;;  %879 = vrot.lane.b32.xlu1 %v2216_v1, %s2517_s2 }
 0xc4f   :  { %945 = vrot.lane.b32.xlu0 %v2218_v3, %s2517_s2  ;;  %v2220_v38 = vpop.eup %2219 }
 0xc50   :  { %v2222_v39 = vpop.eup %2221  ;;  %v860_v40 = vadd.f32 1.0, %v2220_v38 }
 0xc51   :  { %v923_v45 = vadd.f32 1.0, %v2222_v39 }
 0xc52   :  { %2223 = vrcp.f32 %v860_v40  ;;  %v872_v23 = vand.u32 2147483648, %v860_v40  ;;  %vm866_vm4 = vweird.f32 %v860_v40  ;;  %v870_v25 = vand.u32 2147483647, %v860_v40 }
 0xc53   :  { %2225 = vrcp.f32 %v923_v45  ;;  %v935_v26 = vand.u32 2147483648, %v923_v45  ;;  %vm929_vm8 = vweird.f32 %v923_v45  ;;  %v933_v27 = vand.u32 2147483647, %v923_v45 }
 0xc54   :  { %v873_v30 = vor.u32 1.1754944e-38, %v872_v23  ;;  %vm871_vm10 = vcmp.eq.f32.partialorder %v870_v25, 8.507059e+37 }
 0xc55   :  { %v936_v33 = vor.u32 1.1754944e-38, %v935_v26  ;;  %vm934_vm11 = vcmp.eq.f32.partialorder %v933_v27, 8.507059e+37 }
 0xc58   :  { %v2224_v43 = vpop.eup %2223 }
 0xc59   :  { %v2226_v58 = vpop.eup %2225  ;;  %v862_v9 = vmul.f32 %v2224_v43, %v860_v40  ;;  %vm867_vm1 = vweird.f32 %v2224_v43 }
 0xc5a   :  { %v925_v56 = vmul.f32 %v2226_v58, %v923_v45  ;;  %vm930_vm2 = vweird.f32 %v2226_v58  ;;  %vm868_vm7 = vmor %vm866_vm4, %vm867_vm1 }
 0xc5b   :  { %v863_v18 = vsub.f32 1.0, %v862_v9  ;;  %vm931_vm9 = vmor %vm929_vm8, %vm930_vm2 }
 0xc5c   :  { %v926_v19 = vsub.f32 1.0, %v925_v56 }
 0xc5d   :  { %v864_v20 = vmul.f32 %v2224_v43, %v863_v18 }
 0xc5e   :  { %v927_v21 = vmul.f32 %v2226_v58, %v926_v19 }
 0xc5f   :  { %v865_v22 = vadd.f32 %v2224_v43, %v864_v20 }
 0xc60   :  { %v928_v24 = vadd.f32 %v2226_v58, %v927_v21 }
 0xc61   :  { %v869_v29 = vsel %vm868_vm7, %v2224_v43, %v865_v22 }
 0xc62   :  { %v932_v31 = vsel %vm931_vm9, %v2226_v58, %v928_v24  ;;  %v874_v44 = vsel %vm871_vm10, %v873_v30, %v869_v29  ;;  %vm1346_vm9 = vcmask 1044480  }
 0xc63   :  { %v937_v32 = vsel %vm934_vm11, %v936_v33, %v932_v31  ;;  %v877_v41 = vmul.f32 %v874_v44, %v2879_v61 }
 0xc64   :  { %v943_v52 = vmul.f32 %v941_v50, %v937_v32 }
 0xcc0   :  { %v880_v42 = vpop.permute.xlu1 %879 }
 0xcc1   :  { %v882_v47 = vmul.f32 %v880_v42, %v874_v44  ;;  %v946_v48 = vpop.permute.xlu0 %945 }
 0xcc2   :  { %v948_v49 = vmul.f32 %v946_v48, %v937_v32 }
 0xcc3   :  { %884 = vrot.lane.b32.xlu0 %v882_v47, %s2518_s27 }
 0xcc4   :  { %950 = vrot.lane.b32.xlu2 %v948_v49, %s2518_s27 }
 0xd1e   :  { %v951_v53 = vpop.permute.xlu2 %950 }
 0xd1f   :  { %v2906_v54 = vadd.f32 %v951_v53, %v943_v52 }
 0xd21   :  { %2227 = vtanh.f32 %v2906_v54  ;;  %v1081_v53 = vrot.slane %v2906_v54, 6 }
 0xd27   :  { %v2228_v57 = vpop.eup %2227 }
 0xd28   :  { %956 = vrot.lane.b32.xlu1 %v2228_v57, %s2517_s2 }
 0xd35   :  { %v885_v60 = vpop.permute.xlu0 %884 }
 0xd36   :  { %v2911_v62 = vadd.f32 %v885_v60, %v877_v41 }
 0xd38   :  { %2229 = vtanh.f32 %v2911_v62 }
 0xd3e   :  { %v2230_v63 = vpop.eup %2229 }
 0xd3f   :  { %890 = vrot.lane.b32.xlu2 %v2230_v63, %s2517_s2 }
 0xd99   :  { %v891_v51 = vpop.permute.xlu2 %890 }
 0xd9a   :  { %v893_v0 = vmul.f32 %v891_v51, %v874_v44  ;;  %v957_v2 = vpop.permute.xlu1 %956 }
 0xd9b   :  { %v959_v4 = vmul.f32 %v957_v2, %v937_v32 }
 0xd9c   :  { %v1317_v28 = vrot.slane %v893_v0, 4  ;;  %v1331_v5 = vrot.slane %v893_v0, 5  ;;  %v965_v55 = vrot.slane %v893_v0, 6 }
 0xd9d   :  { %v1031_v8 = vrot.slane %v959_v4, 2  ;;  %961 = vrot.lane.b32.xlu1 %v959_v4, %s2518_s27 }
 0xd9e   :  { %966 = vrot.lane.b32.xlu2 %v965_v55, %s2517_s2  ;;  %v2918_v61 = vsel %vm1344_vm12, %v2894_v13, %v1331_v5  ;;  %v2921_v10 = vsel %vm1344_vm12, %v2891_v59, %v1317_v28 }
 0xd9f   :  { %1032 = vrot.lane.b32.xlu0 %v1031_v8, %s2518_s27 }
 0xdf8   :  { %v967_v12 = vpop.permute.xlu2 %966 }
 0xe0f   :  { %v962_v14 = vpop.permute.xlu1 %961 }
 0xe10   :  { %v969_v15 = vsel %vm214_vm5, %v962_v14, %v967_v12 }
 0xe11   :  { %v971_v6 = vrot.slane %v969_v15, 2  ;;  %v1033_v7 = vpop.permute.xlu0 %1032 }
 0xe12   :  { %2077 = vmatmul.msk.f32.vlgmr.msra.gmra.mxu2 %vm214_vm5, %v1033_v7 }
 0xe13   :  { %2075 = vmatmul.msk.f32.vlgmr.msra.gmra.mxu0 %vm281_vm6, %v971_v6 }
 0xe90   :  { %v991_v16 = vpop.f32.mrf.mxu0 }
 0xe91   :  { %v992_v17 = vadd.f32 %v2747_v46, %v991_v16 }
 0xe93   :  { %2231 = vtanh.f32 %v992_v17  ;;  %v2076_v3 = vmul.f32 -1.442695, %v992_v17 }
 0xe95   :  { %v1053_v13 = vpop.f32.mrf.mxu2 }
 0xe96   :  { %v1057_v11 = vrot.slane %v1053_v13, 4  ;;  %v2957_v13 = vld [vmem:[#allocation8] ss:$0 sm:$0xff] }
 0xe98   :  { %v1059_v59 = vadd.f32 %v1057_v11, %v2870_v34 }
 0xe99   :  { %v2232_v35 = vpop.eup %2231 }
 0xe9a   :  { %2233 = vtanh.f32 %v1059_v59  ;;  %1016 = vrot.lane.b32.xlu0 %v2232_v35, %s2517_s2  ;;  %v2078_v36 = vmul.f32 -1.442695, %v1059_v59 }
 0xe9b   :  { %2235 = vpow2.f32 %v2076_v3 }
 0xe9c   :  { %2237 = vpow2.f32 %v2078_v36 }
 0xea0   :  { %v2234_v1 = vpop.eup %2233 }
 0xea1   :  { %1085 = vrot.lane.b32.xlu1 %v2234_v1, %s2517_s2  ;;  %v2236_v37 = vpop.eup %2235 }
 0xea2   :  { %v997_v38 = vadd.f32 1.0, %v2236_v37  ;;  %v2238_v39 = vpop.eup %2237 }
 0xea3   :  { %v1063_v46 = vadd.f32 1.0, %v2238_v39 }
 0xea4   :  { %2239 = vrcp.f32 %v997_v38  ;;  %v1009_v20 = vand.u32 2147483648, %v997_v38  ;;  %vm1003_vm14 = vweird.f32 %v997_v38  ;;  %v1007_v21 = vand.u32 2147483647, %v997_v38 }
 0xea5   :  { %2241 = vrcp.f32 %v1063_v46  ;;  %v1075_v30 = vand.u32 2147483648, %v1063_v46  ;;  %vm1069_vm4 = vweird.f32 %v1063_v46  ;;  %v1073_v31 = vand.u32 2147483647, %v1063_v46 }
 0xea6   :  { %v1010_v24 = vor.u32 1.1754944e-38, %v1009_v20  ;;  %vm1008_vm1 = vcmp.eq.f32.partialorder %v1007_v21, 8.507059e+37 }
 0xea7   :  { %v1076_v42 = vor.u32 1.1754944e-38, %v1075_v30  ;;  %vm1074_vm8 = vcmp.eq.f32.partialorder %v1073_v31, 8.507059e+37 }
 0xeaa   :  { %v2240_v40 = vpop.eup %2239 }
 0xeab   :  { %v999_v45 = vmul.f32 %v2240_v40, %v997_v38  ;;  %v2242_v43 = vpop.eup %2241  ;;  %vm1004_vm13 = vweird.f32 %v2240_v40 }
 0xeac   :  { %v1065_v9 = vmul.f32 %v2242_v43, %v1063_v46  ;;  %vm1005_vm15 = vmor %vm1003_vm14, %vm1004_vm13  ;;  %vm1070_vm2 = vweird.f32 %v2242_v43 }
 0xead   :  { %v1000_v58 = vsub.f32 1.0, %v999_v45  ;;  %vm1071_vm7 = vmor %vm1069_vm4, %vm1070_vm2  ;;  %vm1348_vm4 = vcmask 1045504  }
 0xeae   :  { %v1066_v18 = vsub.f32 1.0, %v1065_v9 }
 0xeaf   :  { %v1001_v56 = vmul.f32 %v2240_v40, %v1000_v58 }
 0xeb0   :  { %v1067_v22 = vmul.f32 %v2242_v43, %v1066_v18 }
 0xeb1   :  { %v1002_v19 = vadd.f32 %v2240_v40, %v1001_v56 }
 0xeb2   :  { %v1068_v27 = vadd.f32 %v2242_v43, %v1067_v22 }
 0xeb3   :  { %v1006_v23 = vsel %vm1005_vm15, %v2240_v40, %v1002_v19 }
 0xeb4   :  { %v1011_v25 = vsel %vm1008_vm1, %v1010_v24, %v1006_v23  ;;  %v1072_v33 = vsel %vm1071_vm7, %v2242_v43, %v1068_v27 }
 0xeb5   :  { %v1077_v47 = vsel %vm1074_vm8, %v1076_v42, %v1072_v33  ;;  %v1014_v48 = vmul.f32 %v1011_v25, %v2911_v62 }
 0xeb6   :  { %v1083_v57 = vmul.f32 %v1081_v53, %v1077_v47 }
 0xf0c   :  { %v1017_v26 = vpop.permute.xlu0 %1016 }
 0xf0d   :  { %v1019_v29 = vmul.f32 %v1017_v26, %v1011_v25 }
 0xf0f   :  { %1021 = vrot.lane.b32.xlu2 %v1019_v29, %s2518_s27 }
 0xf13   :  { %v1086_v44 = vpop.permute.xlu1 %1085 }
 0xf14   :  { %v1088_v32 = vmul.f32 %v1086_v44, %v1077_v47 }
 0xf16   :  { %1090 = vrot.lane.b32.xlu0 %v1088_v32, %s2518_s27 }
 0xf69   :  { %v1022_v49 = vpop.permute.xlu2 %1021 }
 0xf6a   :  { %v2934_v50 = vadd.f32 %v1022_v49, %v1014_v48 }
 0xf6c   :  { %2243 = vtanh.f32 %v2934_v50 }
 0xf72   :  { %v2244_v52 = vpop.eup %2243 }
 0xf73   :  { %1027 = vrot.lane.b32.xlu1 %v2244_v52, %s2517_s2 }
 0xf88   :  { %v1091_v41 = vpop.permute.xlu0 %1090 }
 0xf89   :  { %v2939_v60 = vadd.f32 %v1091_v41, %v1083_v57 }
 0xf8b   :  { %2245 = vtanh.f32 %v2939_v60  ;;  %v1221_v44 = vrot.slane %v2939_v60, 6 }
 0xf91   :  { %v2246_v63 = vpop.eup %2245 }
 0xf92   :  { %1096 = vrot.lane.b32.xlu2 %v2246_v63, %s2517_s2 }
 0xfe5   :  { %v1028_v62 = vpop.permute.xlu1 %1027 }
 0xfe6   :  { %v1030_v51 = vmul.f32 %v1028_v62, %v1011_v25 }
 0xfe8   :  { %v1105_v0 = vrot.slane %v1030_v51, 4  ;;  %v1319_v2 = vrot.slane %v1030_v51, 3 }
 0xfea   :  { %1106 = vrot.lane.b32.xlu1 %v1105_v0, %s2517_s2  ;;  %v2945_v4 = vsel %vm1346_vm9, %v2918_v61, %v1105_v0  ;;  %v2948_v54 = vsel %vm1346_vm9, %v2921_v10, %v1319_v2 }
 0xfec   :  { %v1097_v28 = vpop.permute.xlu2 %1096 }
 0xfed   :  { %v1099_v5 = vmul.f32 %v1097_v28, %v1077_v47 }
 0xfef   :  { %v1171_v55 = vrot.slane %v1099_v5, 4  ;;  %1101 = vrot.lane.b32.xlu0 %v1099_v5, %s2518_s27 }
 0xff1   :  { %1172 = vrot.lane.b32.xlu2 %v1171_v55, %s2518_s27 }
0x104b   :  { %v1173_v8 = vpop.permute.xlu2 %1172 }
0x104c   :  { %2081 = vmatmul.msk.f32.vlgmr.msra.gmra.mxu1 %vm214_vm5, %v1173_v8 }
0x105c   :  { %v1107_v12 = vpop.permute.xlu1 %1106 }
0x1061   :  { %v1102_v14 = vpop.permute.xlu0 %1101 }
0x1062   :  { %v1109_v15 = vsel %vm214_vm5, %v1102_v14, %v1107_v12 }
0x1063   :  { %v1111_v6 = vrot.slane %v1109_v15, 4 }
0x1065   :  { %2079 = vmatmul.msk.f32.vlgmr.msra.gmra.mxu3 %vm281_vm6, %v1111_v6 }
0x10c9   :  { %v1193_v61 = vpop.f32.mrf.mxu1 }
0x10ca   :  { %v1197_v10 = vrot.slane %v1193_v61, 2 }
0x10cc   :  { %v1199_v7 = vadd.f32 %v1197_v10, %v2870_v34 }
0x10ce   :  { %2247 = vtanh.f32 %v1199_v7  ;;  %v2082_v35 = vmul.f32 -1.442695, %v1199_v7 }
0x10d4   :  { %v2248_v16 = vpop.eup %2247 }
0x10d5   :  { %1225 = vrot.lane.b32.xlu1 %v2248_v16, %s2517_s2 }
0x10e8   :  { %v1131_v17 = vpop.f32.mrf.mxu3 }
0x10e9   :  { %v1132_v11 = vadd.f32 %v2957_v13, %v1131_v17 }
0x10eb   :  { %2249 = vtanh.f32 %v1132_v11  ;;  %v2080_v37 = vmul.f32 -1.442695, %v1132_v11 }
0x10ec   :  { %2251 = vpow2.f32 %v2082_v35 }
0x10f1   :  { %v2250_v59 = vpop.eup %2249 }
0x10f2   :  { %1156 = vrot.lane.b32.xlu0 %v2250_v59, %s2517_s2  ;;  %v2252_v1 = vpop.eup %2251 }
0x10f3   :  { %v1203_v3 = vadd.f32 1.0, %v2252_v1 }
0x10f5   :  { %2253 = vrcp.f32 %v1203_v3  ;;  %v1215_v45 = vand.u32 2147483648, %v1203_v3  ;;  %vm1209_vm11 = vweird.f32 %v1203_v3  ;;  %v1213_v43 = vand.u32 2147483647, %v1203_v3 }
0x10f6   :  { %2255 = vpow2.f32 %v2080_v37 }
0x10f7   :  { %v1216_v56 = vor.u32 1.1754944e-38, %v1215_v45  ;;  %vm1214_vm13 = vcmp.eq.f32.partialorder %v1213_v43, 8.507059e+37  ;;  %v1361_v45 = vld [vmem:[#allocation10 + $0x10] sm:$0xff]  ;;  %v1360_v43 = vld [vmem:[#allocation10 + $0x8] sm:$0xff] }
0x10fb   :  { %v2254_v36 = vpop.eup %2253 }
0x10fc   :  { %v1205_v34 = vmul.f32 %v2254_v36, %v1203_v3  ;;  %vm1210_vm10 = vweird.f32 %v2254_v36  ;;  %v2256_v40 = vpop.eup %2255 }
0x10fd   :  { %vm1211_vm12 = vmor %vm1209_vm11, %vm1210_vm10  ;;  %v1137_v58 = vadd.f32 1.0, %v2256_v40  ;;  %v1362_v40 = vld [vmem:[#allocation10 + $0x18] sm:$0xff]  ;;  %vm1350_vm10 = vcmask 1046528   ;;  %vm1403_vm11 = vcmask 64512  }
0x10fe   :  { %v1206_v38 = vsub.f32 1.0, %v1205_v34  ;;  %1389 = vmatpush.msrb.mxu0 %v1362_v40 }
0x10ff   :  { %2257 = vrcp.f32 %v1137_v58  ;;  %v1149_v26 = vand.u32 2147483648, %v1137_v58  ;;  %vm1143_vm15 = vweird.f32 %v1137_v58  ;;  %v1147_v27 = vand.u32 2147483647, %v1137_v58 }
0x1100   :  { %v1207_v39 = vmul.f32 %v2254_v36, %v1206_v38  ;;  %1390 = vmatpush.msrb.mxu0 %v1361_v45 }
0x1101   :  { %v1150_v30 = vor.u32 1.1754944e-38, %v1149_v26  ;;  %vm1148_vm2 = vcmp.eq.f32.partialorder %v1147_v27, 8.507059e+37 }
0x1102   :  { %v1208_v46 = vadd.f32 %v2254_v36, %v1207_v39  ;;  %1391 = vmatpush.msrb.mxu0 %v1360_v43 }
0x1104   :  { %v1212_v9 = vsel %vm1211_vm12, %v2254_v36, %v1208_v46  ;;  %vm1837_vm12 = vcmask 195584  }
0x1105   :  { %v1217_v19 = vsel %vm1214_vm13, %v1216_v56, %v1212_v9  ;;  %v2258_v21 = vpop.eup %2257  ;;  %vm2011_vm13 = vcmask 1048320  }
0x1106   :  { %v1139_v22 = vmul.f32 %v2258_v21, %v1137_v58  ;;  %vm1144_vm14 = vweird.f32 %v2258_v21  ;;  %v1223_v47 = vmul.f32 %v1221_v44, %v1217_v19  ;;  %v1359_v58 = vld [vmem:[#allocation10] sm:$0xff] }
0x1107   :  { %vm1145_vm1 = vmor %vm1143_vm15, %vm1144_vm14  ;;  %1392 = vmatpush.msrb.mxu0 %v1359_v58 }
0x1108   :  { %v1140_v23 = vsub.f32 1.0, %v1139_v22 }
0x110a   :  { %v1141_v24 = vmul.f32 %v2258_v21, %v1140_v23 }
0x110c   :  { %v1142_v25 = vadd.f32 %v2258_v21, %v1141_v24  ;;  %v2140_v24 = vld [vmem:[#allocation11] ss:$0 sm:$0xff] }
0x110e   :  { %v1146_v29 = vsel %vm1145_vm1, %v2258_v21, %v1142_v25 }
0x110f   :  { %v1151_v33 = vsel %vm1148_vm2, %v1150_v30, %v1146_v29 }
0x1110   :  { %v1154_v49 = vmul.f32 %v1151_v33, %v2934_v50 }
0x1147   :  { %v1226_v18 = vpop.permute.xlu1 %1225 }
0x1148   :  { %v1228_v20 = vmul.f32 %v1226_v18, %v1217_v19 }
0x114a   :  { %1230 = vrot.lane.b32.xlu0 %v1228_v20, %s2518_s27 }
0x1164   :  { %v1157_v31 = vpop.permute.xlu0 %1156 }
0x1165   :  { %v1159_v42 = vmul.f32 %v1157_v31, %v1151_v33 }
0x1167   :  { %1161 = vrot.lane.b32.xlu2 %v1159_v42, %s2518_s27 }
0x11bc   :  { %v1231_v32 = vpop.permute.xlu0 %1230 }
0x11bd   :  { %v1233_v48 = vadd.f32 %v1231_v32, %v1223_v47 }
0x11bf   :  { %2259 = vtanh.f32 %v1233_v48 }
0x11c1   :  { %v1162_v52 = vpop.permute.xlu2 %1161 }
0x11c2   :  { %v1164_v53 = vadd.f32 %v1162_v52, %v1154_v49 }
0x11c4   :  { %2261 = vtanh.f32 %v1164_v53 }
0x11c5   :  { %v2260_v57 = vpop.eup %2259 }
0x11c6   :  { %1236 = vrot.lane.b32.xlu2 %v2260_v57, %s2517_s2 }
0x11ca   :  { %v2262_v41 = vpop.eup %2261 }
0x11cb   :  { %1167 = vrot.lane.b32.xlu1 %v2262_v41, %s2517_s2 }
0x1220   :  { %v1237_v63 = vpop.permute.xlu2 %1236 }
0x1221   :  { %v1239_v62 = vmul.f32 %v1237_v63, %v1217_v19 }
0x1223   :  { %1241 = vrot.lane.b32.xlu0 %v1239_v62, %s2518_s27 }
0x123d   :  { %v1168_v60 = vpop.permute.xlu1 %1167 }
0x123e   :  { %v1170_v51 = vmul.f32 %v1168_v60, %v1151_v33 }
0x1240   :  { %v1245_v0 = vrot.slane %v1170_v51, 2  ;;  %v1334_v2 = vrot.slane %v1170_v51, 3 }
0x1242   :  { %1246 = vrot.lane.b32.xlu1 %v1245_v0, %s2517_s2  ;;  %v1357_v50 = vsel %vm1348_vm4, %v2945_v4, %v1334_v2  ;;  %v1349_v28 = vsel %vm1348_vm4, %v2948_v54, %v1245_v0 }
0x1295   :  { %v1242_v5 = vpop.permute.xlu0 %1241 }
0x12b4   :  { %v1247_v55 = vpop.permute.xlu1 %1246 }
0x12b5   :  { %v1249_v8 = vsel %vm214_vm5, %v1242_v5, %v1247_v55 }
0x12b6   :  { %v1251_v12 = vrot.slane %v1249_v8, 6 }
0x12b8   :  { %2083 = vmatmul.msk.f32.vlgmr.msrb.gmra.mxu2 %vm281_vm6, %v1251_v12 }
0x133b   :  { %v1271_v14 = vpop.f32.mrf.mxu2 }
0x133c   :  { %v1272_v15 = vadd.f32 %v2957_v13, %v1271_v14 }
0x133e   :  { %2263 = vtanh.f32 %v1272_v15  ;;  %v2084_v61 = vmul.f32 -1.442695, %v1272_v15 }
0x1340   :  { %2265 = vpow2.f32 %v2084_v61 }
0x1344   :  { %v2264_v6 = vpop.eup %2263 }
0x1345   :  { %1296 = vrot.lane.b32.xlu2 %v2264_v6, %s2517_s2 }
0x1346   :  { %v2266_v10 = vpop.eup %2265 }
0x1347   :  { %v1277_v4 = vadd.f32 1.0, %v2266_v10 }
0x1349   :  { %2267 = vrcp.f32 %v1277_v4  ;;  %v1289_v59 = vand.u32 2147483648, %v1277_v4  ;;  %vm1283_vm6 = vweird.f32 %v1277_v4  ;;  %v1287_v35 = vand.u32 2147483647, %v1277_v4 }
0x134b   :  { %v1290_v1 = vor.u32 1.1754944e-38, %v1289_v59  ;;  %vm1288_vm9 = vcmp.eq.f32.partialorder %v1287_v35, 8.507059e+37 }
0x134f   :  { %v2268_v54 = vpop.eup %2267 }
0x1350   :  { %v1279_v7 = vmul.f32 %v2268_v54, %v1277_v4  ;;  %vm1284_vm7 = vweird.f32 %v2268_v54 }
0x1351   :  { %vm1285_vm8 = vmor %vm1283_vm6, %vm1284_vm7 }
0x1352   :  { %v1280_v16 = vsub.f32 1.0, %v1279_v7 }
0x1354   :  { %v1281_v17 = vmul.f32 %v2268_v54, %v1280_v16 }
0x1356   :  { %v1282_v11 = vadd.f32 %v2268_v54, %v1281_v17 }
0x1358   :  { %v1286_v13 = vsel %vm1285_vm8, %v2268_v54, %v1282_v11 }
0x1359   :  { %v1291_v36 = vsel %vm1288_vm9, %v1290_v1, %v1286_v13 }
0x135a   :  { %v1294_v37 = vmul.f32 %v1291_v36, %v1164_v53 }
0x139f   :  { %v1297_v3 = vpop.permute.xlu2 %1296 }
0x13a0   :  { %v1299_v34 = vmul.f32 %v1297_v3, %v1291_v36 }
0x13a2   :  { %1301 = vrot.lane.b32.xlu0 %v1299_v34, %s2518_s27 }
0x1414   :  { %v1302_v38 = vpop.permute.xlu0 %1301 }
0x1415   :  { %v1304_v39 = vadd.f32 %v1302_v38, %v1294_v37 }
0x1417   :  { %2269 = vtanh.f32 %v1304_v39 }
0x141d   :  { %v2270_v46 = vpop.eup %2269 }
0x141e   :  { %1307 = vrot.lane.b32.xlu1 %v2270_v46, %s2517_s2 }
0x1490   :  { %v1308_v9 = vpop.permute.xlu1 %1307 }
0x1491   :  { %v1310_v56 = vmul.f32 %v1308_v9, %v1291_v36 }
0x1493   :  { %v1323_v18 = vrot.slane %v1310_v56, 1  ;;  %v1336_v19 = vrot.slane %v1310_v56, 2 }
0x1495   :  { %v2977_v20 = vsel %vm1350_vm10, %v1357_v50, %v1336_v19  ;;  %v2979_v21 = vsel %vm1350_vm10, %v1349_v28, %v1323_v18 }
0x1496   :  { %1371 = vrot.lane.b32.xlu0 %v2977_v20, %s2518_s27  ;;  %1369 = vrot.lane.b32.xlu2 %v2979_v21, %s2518_s27 }
0x14f0   :  { %v1370_v22 = vpop.permute.xlu2 %1369 }
0x14f1   :  { %2085 = vmatmul.msk.f32.vlgmr.msrb.gmra.mxu0 %vm214_vm5, %v1370_v22 }
0x1508   :  { %v1372_v23 = vpop.permute.xlu0 %1371 }
0x1509   :  { %2086 = vmatmul.msk.f32.gmra.mxu0 %vm214_vm5, %v1372_v23 }
0x156e   :  { %v1394_v25 = vpop.f32.mrf.mxu0 }
0x156f   :  { %v2987_v26 = vadd.f32 %v2140_v24, %v1394_v25 }
0x1571   :  { %1487 = vrot.lane.b32.xlu0 %v2987_v26, %s2519_s0  ;;  %1401 = vrot.lane.b32.xlu2 %v2987_v26, %s2520_s29 }
0x1572   :  { %1489 = vrot.lane.b32.xlu1 %v2987_v26, %s2521_s30 }
0x1579   :  { %1429 = vrot.lane.b32.xlu2 %v2987_v26, %s2522_s11 }
0x157a   :  { %1431 = vrot.lane.b32.xlu1 %v2987_v26, %s2523_s13 }
0x1582   :  { %1460 = vrot.lane.b32.xlu1 %v2987_v26, %s2524_s14 }
0x1586   :  { %v1397_v27 = vpop.f32.mrf.mxu0 }
0x1587   :  { %v2996_v29 = vadd.f32 %v2140_v24, %v1397_v27 }
0x1589   :  { %1604 = vrot.lane.b32.xlu0 %v2996_v29, %s2521_s30  ;;  %1602 = vrot.lane.b32.xlu2 %v2996_v29, %s2519_s0 }
0x158a   :  { %1546 = vrot.lane.b32.xlu1 %v2996_v29, %s2523_s13 }
0x1591   :  { %1458 = vrot.lane.b32.xlu0 %v2987_v26, %s2525_s15  ;;  %1575 = vrot.lane.b32.xlu2 %v2996_v29, %s2524_s14 }
0x1592   :  { %1573 = vrot.lane.b32.xlu1 %v2996_v29, %s2525_s15 }
0x1599   :  { %1544 = vrot.lane.b32.xlu0 %v2996_v29, %s2522_s11  ;;  %1517 = vrot.lane.b32.xlu2 %v2996_v29, %s2520_s29 }
0x15cb   :  { %v1402_v30 = vpop.permute.xlu2 %1401 }
0x15cc   :  { %2087 = vmatpush.xpose.msk.msrb.mxu1 %vm1403_vm11, %v1402_v30 }
0x15cf   :  { %2088 = vmatmul.msk.f32.vlgmr.msrb.gmra.mxu1 %vm1403_vm11, %v2987_v26 }
0x15d3   :  { %v1430_v31 = vpop.permute.xlu2 %1429 }
0x15e3   :  { %v1603_v33 = vpop.permute.xlu2 %1602  ;;  %v1488_v44 = vpop.permute.xlu0 %1487 }
0x15e4   :  { %v1490_v42 = vpop.permute.xlu1 %1489 }
0x15e5   :  { %2093 = vmatpush.xpose.msk.msra.mxu2 %vm1403_vm11, %v1490_v42 }
0x15e8   :  { %2094 = vmatmul.msk.f32.vlgmr.msra.gmra.mxu2 %vm1403_vm11, %v1488_v44 }
0x15eb   :  { %v1576_v47 = vpop.permute.xlu2 %1575 }
0x15ec   :  { %v1432_v32 = vpop.permute.xlu1 %1431 }
0x15ed   :  { %2089 = vmatpush.xpose.msk.msrb.mxu3 %vm1403_vm11, %v1432_v32 }
0x15f0   :  { %2090 = vmatmul.msk.f32.vlgmr.msrb.gmra.mxu3 %vm1403_vm11, %v1430_v31 }
0x15f3   :  { %v1518_v48 = vpop.permute.xlu2 %1517 }
0x15f4   :  { %v1461_v49 = vpop.permute.xlu1 %1460  ;;  %2095 = vmatpush.xpose.msk.msra.mxu3 %vm1403_vm11, %v1518_v48 }
0x15f5   :  { %2091 = vmatpush.xpose.msk.msra.mxu1 %vm1403_vm11, %v1461_v49 }
0x15f8   :  { %2096 = vmatmul.msk.f32.vlgmr.msra.gmra.mxu3 %vm1403_vm11, %v2996_v29 }
0x15f9   :  { %2099 = vmatpush.xpose.msk.msrb.mxu1 %vm1403_vm11, %v1576_v47 }
0x15fb   :  { %v1605_v52 = vpop.permute.xlu0 %1604 }
0x15fc   :  { %v1547_v53 = vpop.permute.xlu1 %1546  ;;  %2101 = vmatpush.xpose.msk.msrb.mxu2 %vm1403_vm11, %v1605_v52 }
0x15fd   :  { %2097 = vmatpush.xpose.msk.msra.mxu0 %vm1403_vm11, %v1547_v53 }
0x15ff   :  { %2102 = vmatmul.msk.f32.vlgmr.msrb.gmra.mxu2 %vm1403_vm11, %v1603_v33 }
0x1603   :  { %v1459_v57 = vpop.permute.xlu0 %1458 }
0x1604   :  { %2092 = vmatmul.msk.f32.vlgmr.msra.gmra.mxu1 %vm1403_vm11, %v1459_v57  ;;  %v1574_v41 = vpop.permute.xlu1 %1573 }
0x160b   :  { %v1545_v63 = vpop.permute.xlu0 %1544 }
0x160c   :  { %2098 = vmatmul.msk.f32.vlgmr.msra.gmra.mxu0 %vm1403_vm11, %v1545_v63  ;;  %2100 = vmatmul.msk.f32.vlgmr.msrb.gmra.mxu1 %vm1403_vm11, %v1574_v41 }
0x164c   :  { %v1425_v62 = vpop.f32.mrf.mxu1 }
0x164d   :  { %v3025_v60 = vmul.f32 0.35355338, %v1425_v62 }
0x164f   :  { %v1631_v51 = vsel %vm1403_vm11, %v3025_v60, -inf }
0x1650   :  { %1632 = vmax.xlane.f32.xlu2 %v1631_v51 }
0x166b   :  { %v1512_v0 = vpop.f32.mrf.mxu2 }
0x166c   :  { %v1515_v2 = vmul.f32 0.35355338, %v1512_v0 }
0x166e   :  { %v1640_v50 = vsel %vm1403_vm11, %v1515_v2, -inf }
0x166f   :  { %1641 = vmax.xlane.f32.xlu0 %v1640_v50 }
0x1673   :  { %v1454_v28 = vpop.f32.mrf.mxu3 }
0x1674   :  { %v1457_v5 = vmul.f32 0.35355338, %v1454_v28 }
0x1676   :  { %v1634_v55 = vsel %vm1403_vm11, %v1457_v5, -inf }
0x1677   :  { %1635 = vmax.xlane.f32.xlu1 %v1634_v55 }
0x167b   :  { %v1540_v11 = vpop.f32.mrf.mxu3 }
0x167c   :  { %v1543_v59 = vmul.f32 0.35355338, %v1540_v11 }
0x167e   :  { %v1643_v35 = vsel %vm1403_vm11, %v1543_v59, -inf }
0x1681   :  { %v1483_v8 = vpop.f32.mrf.mxu1 }
0x1682   :  { %v1486_v12 = vmul.f32 0.35355338, %v1483_v8  ;;  %v1627_v15 = vpop.f32.mrf.mxu2 }
0x1683   :  { %v1630_v6 = vmul.f32 0.35355338, %v1627_v15 }
0x1684   :  { %v1637_v14 = vsel %vm1403_vm11, %v1486_v12, -inf }
0x1685   :  { %1638 = vmax.xlane.f32.xlu2 %v1637_v14  ;;  %v1652_v7 = vsel %vm1403_vm11, %v1630_v6, -inf }
0x1689   :  { %v1569_v61 = vpop.f32.mrf.mxu0  ;;  %v1598_v10 = vpop.f32.mrf.mxu1 }
0x168a   :  { %v1572_v4 = vmul.f32 0.35355338, %v1569_v61  ;;  %v1601_v54 = vmul.f32 0.35355338, %v1598_v10 }
0x168c   :  { %v1646_v16 = vsel %vm1403_vm11, %v1572_v4, -inf  ;;  %v1649_v17 = vsel %vm1403_vm11, %v1601_v54, -inf }
0x168d   :  { %1653 = vmax.xlane.f32.xlu2 %v1652_v7  ;;  %1647 = vmax.xlane.f32.xlu0 %v1646_v16 }
0x168e   :  { %1650 = vmax.xlane.f32.xlu1 %v1649_v17 }
0x16a1   :  { %1745 = vrot.lane.b32.xlu0 %v2987_v26, %s2526_s4 }
0x16a5   :  { %1797 = vrot.lane.b32.xlu2 %v2987_v26, %s2527_s16 }
0x16c3   :  { %v1633_v46 = vpop.xlane.xlu2 %1632 }
0x16c4   :  { %v1655_v62 = vsub.f32 %v3025_v60, %v1633_v46 }
0x16c6   :  { %v1663_v0 = vmul.f32 1.442695, %v1655_v62 }
0x16cb   :  { %1644 = vmax.xlane.f32.xlu0 %v1643_v35 }
0x16e2   :  { %v1642_v13 = vpop.xlane.xlu0 %1641 }
0x16e3   :  { %v1658_v1 = vsub.f32 %v1515_v2, %v1642_v13 }
0x16e5   :  { %v1669_v3 = vmul.f32 1.442695, %v1658_v1 }
0x16e7   :  { %2271 = vpow2.f32 %v1669_v3 }
0x16ea   :  { %v1636_v36 = vpop.xlane.xlu1 %1635 }
0x16eb   :  { %v1656_v34 = vsub.f32 %v1457_v5, %v1636_v36 }
0x16ed   :  { %v3040_v37 = vpop.eup %2271  ;;  %v1665_v38 = vmul.f32 1.442695, %v1656_v34 }
0x16ee   :  { %v1688_v39 = vsel %vm1403_vm11, %v3040_v37, 0.0 }
0x16ef   :  { %2273 = vpow2.f32 %v1665_v38  ;;  %1689 = vadd.xlane.f32.xlu1 %v1688_v39 }
0x16f5   :  { %v3044_v40 = vpop.eup %2273 }
0x16f6   :  { %v1682_v45 = vsel %vm1403_vm11, %v3044_v40, 0.0 }
0x16f7   :  { %1683 = vadd.xlane.f32.xlu2 %v1682_v45 }
0x16f8   :  { %v1639_v43 = vpop.xlane.xlu2 %1638 }
0x16f9   :  { %v1657_v58 = vsub.f32 %v1486_v12, %v1639_v43 }
0x16fb   :  { %v1667_v9 = vmul.f32 1.442695, %v1657_v58 }
0x16fd   :  { %2275 = vpow2.f32 %v1667_v9 }
0x1700   :  { %v1654_v56 = vpop.xlane.xlu2 %1653  ;;  %v1648_v18 = vpop.xlane.xlu0 %1647 }
0x1701   :  { %v1662_v19 = vsub.f32 %v1630_v6, %v1654_v56  ;;  %v1660_v22 = vsub.f32 %v1572_v4, %v1648_v18  ;;  %v1651_v23 = vpop.xlane.xlu1 %1650 }
0x1702   :  { %v1661_v30 = vsub.f32 %v1601_v54, %v1651_v23  ;;  %v1959_v23 = vld [vmem:[#allocation13 + $0x8] sm:$0xff] }
0x1703   :  { %v3048_v24 = vpop.eup %2275  ;;  %v1677_v25 = vmul.f32 1.442695, %v1662_v19  ;;  %v1673_v27 = vmul.f32 1.442695, %v1660_v22  ;;  %v1961_v19 = vld [vmem:[#allocation13 + $0x18] sm:$0xff]  ;;  %v1960_v22 = vld [vmem:[#allocation13 + $0x10] sm:$0xff] }
0x1704   :  { %v1685_v31 = vsel %vm1403_vm11, %v3048_v24, 0.0  ;;  %v1675_v33 = vmul.f32 1.442695, %v1661_v30  ;;  %v2005_v30 = vld [vmem:[%s3114_s10] sm:$0xff] }
0x1705   :  { %2277 = vpow2.f32 %v1677_v25  ;;  %1686 = vadd.xlane.f32.xlu0 %v1685_v31 }
0x1706   :  { %2279 = vpow2.f32 %v1673_v27 }
0x1707   :  { %2281 = vpow2.f32 %v1675_v33 }
0x1708   :  { %v1798_v42 = vpop.permute.xlu2 %1797 }
0x1709   :  { %1818 = vmatpush.msra.mxu2 %v1798_v42 }
0x170b   :  { %v2278_v44 = vpop.eup %2277 }
0x170c   :  { %v2280_v47 = vpop.eup %2279  ;;  %v1700_v32 = vsel %vm1403_vm11, %v2278_v44, 0.0 }
0x170d   :  { %v1694_v48 = vsel %vm1403_vm11, %v2280_v47, 0.0  ;;  %1701 = vadd.xlane.f32.xlu1 %v1700_v32  ;;  %v3056_v49 = vpop.eup %2281 }
0x170e   :  { %1695 = vadd.xlane.f32.xlu0 %v1694_v48  ;;  %v1697_v53 = vsel %vm1403_vm11, %v3056_v49, 0.0 }
0x170f   :  { %1917 = vrot.lane.b32.xlu2 %v2996_v29, %s2527_s16 }
0x1713   :  { %v1746_v52 = vpop.permute.xlu0 %1745 }
0x1714   :  { %1766 = vmatpush.msrb.mxu0 %v1746_v52 }
0x1715   :  { %1698 = vadd.xlane.f32.xlu1 %v1697_v53 }
0x1717   :  { %1891 = vrot.lane.b32.xlu2 %v2996_v29, %s2528_s3 }
0x171f   :  { %1719 = vrot.lane.b32.xlu2 %v2987_v26, %s2517_s2 }
0x1722   :  { %1865 = vrot.lane.b32.xlu0 %v2996_v29, %s2526_s4 }
0x1727   :  { %1839 = vrot.lane.b32.xlu2 %v2996_v29, %s2517_s2 }
0x172e   :  { %1771 = vrot.lane.b32.xlu1 %v2987_v26, %s2528_s3 }
0x173e   :  { %v1645_v57 = vpop.xlane.xlu0 %1644 }
0x173f   :  { %v1659_v41 = vsub.f32 %v1543_v59, %v1645_v57 }
0x1741   :  { %v1671_v63 = vmul.f32 1.442695, %v1659_v41 }
0x1743   :  { %2283 = vpow2.f32 %v1671_v63  ;;  %v2141_v63 = vld [vmem:[#allocation14] ss:$0 sm:$0xff] }
0x1744   :  { %2285 = vpow2.f32 %v1663_v0 }
0x1749   :  { %v2284_v51 = vpop.eup %2283 }
0x174a   :  { %v1691_v2 = vsel %vm1403_vm11, %v2284_v51, 0.0  ;;  %v2286_v50 = vpop.eup %2285 }
0x174b   :  { %v1679_v28 = vsel %vm1403_vm11, %v2286_v50, 0.0 }
0x174c   :  { %1692 = vadd.xlane.f32.xlu0 %v1691_v2 }
0x1758   :  { %1680 = vadd.xlane.f32.xlu1 %v1679_v28 }
0x1762   :  { %v1690_v5 = vpop.xlane.xlu1 %1689 }
0x1763   :  { %2287 = vrcp.f32 %v1690_v5 }
0x1769   :  { %v2288_v29 = vpop.eup %2287 }
0x176a   :  { %v1714_v26 = vmul.f32 %v2288_v29, %v3040_v37  ;;  %v1684_v55 = vpop.xlane.xlu2 %1683 }
0x176b   :  { %2289 = vrcp.f32 %v1684_v55 }
0x176c   :  { %2106 = vmatmul.msk.f32.vlgmr.msra.gmra.mxu2 %vm1403_vm11, %v1714_v26 }
0x1771   :  { %v2290_v60 = vpop.eup %2289 }
0x1772   :  { %v1712_v8 = vmul.f32 %v2290_v60, %v3044_v40  ;;  %v1918_v12 = vpop.permute.xlu2 %1917 }
0x1773   :  { %1938 = vmatpush.msrb.mxu2 %v1918_v12 }
0x1774   :  { %2104 = vmatmul.msk.f32.vlgmr.msrb.gmra.mxu0 %vm1403_vm11, %v1712_v8 }
0x1778   :  { %v1687_v15 = vpop.xlane.xlu0 %1686 }
0x177a   :  { %v1892_v14 = vpop.permute.xlu2 %1891 }
0x1780   :  { %v1702_v6 = vpop.xlane.xlu1 %1701 }
0x1781   :  { %2291 = vrcp.f32 %v1702_v6  ;;  %v1696_v4 = vpop.xlane.xlu0 %1695 }
0x1782   :  { %v1720_v61 = vpop.permute.xlu2 %1719  ;;  %2293 = vrcp.f32 %v1696_v4 }
0x1783   :  { %1740 = vmatpush.msrb.mxu3 %v1720_v61  ;;  %2295 = vrcp.f32 %v1687_v15 }
0x1787   :  { %v2292_v10 = vpop.eup %2291 }
0x1788   :  { %v1718_v54 = vmul.f32 %v2292_v10, %v2278_v44  ;;  %v2294_v16 = vpop.eup %2293  ;;  %v1699_v59 = vpop.xlane.xlu1 %1698 }
0x1789   :  { %v1716_v17 = vmul.f32 %v2294_v16, %v2280_v47  ;;  %v2296_v35 = vpop.eup %2295  ;;  %2297 = vrcp.f32 %v1699_v59 }
0x178a   :  { %v1840_v7 = vpop.permute.xlu2 %1839  ;;  %2110 = vmatmul.msk.f32.vlgmr.msrb.gmra.mxu2 %vm1403_vm11, %v1718_v54  ;;  %v1713_v13 = vmul.f32 %v2296_v35, %v3048_v24  ;;  %v1958_v24 = vld [vmem:[#allocation13] sm:$0xff] }
0x178b   :  { %1860 = vmatpush.msra.mxu3 %v1840_v7 }
0x178f   :  { %v2298_v3 = vpop.eup %2297 }
0x1790   :  { %v1717_v36 = vmul.f32 %v2298_v3, %v3056_v49 }
0x1794   :  { %v1866_v11 = vpop.permute.xlu0 %1865 }
0x1795   :  { %1886 = vmatpush.msra.mxu0 %v1866_v11 }
0x1796   :  { %2108 = vmatmul.msk.f32.vlgmr.msra.gmra.mxu0 %vm1403_vm11, %v1716_v17 }
0x17a0   :  { %v1772_v1 = vpop.permute.xlu1 %1771 }
0x17a1   :  { %1792 = vmatpush.msra.mxu1 %v1772_v1 }
0x17a2   :  { %2105 = vmatmul.msk.f32.vlgmr.msra.gmra.mxu1 %vm1403_vm11, %v1713_v13 }
0x17a3   :  { %1912 = vmatpush.msrb.mxu1 %v1892_v14 }
0x17aa   :  { %2109 = vmatmul.msk.f32.vlgmr.msrb.gmra.mxu1 %vm1403_vm11, %v1717_v36 }
0x17bf   :  { %v1693_v37 = vpop.xlane.xlu0 %1692 }
0x17cb   :  { %v1681_v34 = vpop.xlane.xlu1 %1680 }
0x17cc   :  { %2299 = vrcp.f32 %v1681_v34 }
0x17cd   :  { %2301 = vrcp.f32 %v1693_v37 }
0x17d2   :  { %v2300_v38 = vpop.eup %2299 }
0x17d3   :  { %v1711_v39 = vmul.f32 %v2300_v38, %v2286_v50  ;;  %v2302_v46 = vpop.eup %2301 }
0x17d4   :  { %v1715_v40 = vmul.f32 %v2302_v46, %v2284_v51 }
0x17d5   :  { %2103 = vmatmul.msk.f32.vlgmr.msrb.gmra.mxu3 %vm1403_vm11, %v1711_v39 }
0x17d6   :  { %1984 = vmatpush.msrb.mxu3 %v1961_v19 }
0x17d8   :  { %1985 = vmatpush.msrb.mxu3 %v1960_v22 }
0x17da   :  { %1986 = vmatpush.msrb.mxu3 %v1959_v23 }
0x17dc   :  { %1987 = vmatpush.msrb.mxu3 %v1958_v24 }
0x17dd   :  { %2107 = vmatmul.msk.f32.vlgmr.msra.gmra.mxu3 %vm1403_vm11, %v1715_v40 }
0x17ef   :  { %v1820_v9 = vpop.f32.mrf.mxu2 }
0x17f1   :  { %v1768_v45 = vpop.f32.mrf.mxu0 }
0x17f2   :  { %1824 = vrot.lane.b32.xlu2 %v1768_v45, %s2511_s23 }
0x180d   :  { %v1940_v18 = vpop.f32.mrf.mxu2 }
0x1813   :  { %v1888_v43 = vpop.f32.mrf.mxu0 }
0x1814   :  { %1944 = vrot.lane.b32.xlu1 %v1888_v43, %s2511_s23 }
0x181f   :  { %v1794_v58 = vpop.f32.mrf.mxu1 }
0x1820   :  { %1828 = vrot.lane.b32.xlu2 %v1794_v58, %s2529_s17 }
0x1827   :  { %v1914_v56 = vpop.f32.mrf.mxu1 }
0x1828   :  { %1832 = vrot.lane.b32.xlu2 %v1820_v9, %s2530_s18  ;;  %1948 = vrot.lane.b32.xlu0 %v1914_v56, %s2529_s17 }
0x1830   :  { %1952 = vrot.lane.b32.xlu2 %v1940_v18, %s2530_s18  ;;  %2007 = vrot.lane.b32.xlu0 %v2005_v30, %s2520_s29 }
0x184c   :  { %v1825_v25 = vpop.permute.xlu2 %1824 }
0x1858   :  { %v1742_v31 = vpop.f32.mrf.mxu3 }
0x1859   :  { %v1835_v33 = vsel %vm1403_vm11, %v1742_v31, %v1825_v25 }
0x1860   :  { %v1862_v48 = vpop.f32.mrf.mxu3 }
0x187a   :  { %v1829_v27 = vpop.permute.xlu2 %1828 }
0x187b   :  { %v1836_v42 = vsel %vm184_vm0, %v1835_v33, %v1829_v27 }
0x1882   :  { %v1833_v44 = vpop.permute.xlu2 %1832 }
0x1883   :  { %v1838_v47 = vsel %vm1837_vm12, %v1836_v42, %v1833_v44 }
0x1884   :  { %2111 = vmatmul.msk.f32.vlgmr.msrb.gmra.mxu3 %vm214_vm5, %v1838_v47 }
0x1886   :  { %v1945_v32 = vpop.permute.xlu1 %1944 }
0x1887   :  { %v1955_v49 = vsel %vm1403_vm11, %v1862_v48, %v1945_v32 }
0x188a   :  { %v1953_v53 = vpop.permute.xlu2 %1952 }
0x189a   :  { %v1949_v52 = vpop.permute.xlu0 %1948 }
0x189b   :  { %v1956_v57 = vsel %vm184_vm0, %v1955_v49, %v1949_v52  ;;  %vm2032_vm0 = vcmask 254976  }
0x189c   :  { %v1957_v41 = vsel %vm1837_vm12, %v1956_v57, %v1953_v53 }
0x189d   :  { %2112 = vmatmul.msk.f32.gmra.mxu3 %vm214_vm5, %v1957_v41  ;;  %vm2041_vm5 = vcmask 1024  }
0x18a2   :  { %v2008_v5 = vpop.permute.xlu0 %2007 }
0x1907   :  { %v1989_v62 = vpop.f32.mrf.mxu3 }
0x1908   :  { %v1990_v51 = vadd.f32 %v2141_v63, %v1989_v62 }
0x190a   :  { %1997 = vrot.lane.b32.xlu2 %v1990_v51, %s2520_s29 }
0x1920   :  { %v1992_v0 = vpop.f32.mrf.mxu3 }
0x1921   :  { %v1993_v2 = vadd.f32 %v2141_v63, %v1992_v0 }
0x1923   :  { %1999 = vrot.lane.b32.xlu2 %v1993_v2, %s2520_s29 }
0x1964   :  { %v1998_v50 = vpop.permute.xlu2 %1997 }
0x1965   :  { %v2003_v28 = vmul.f32 %v1998_v50, %v2979_v21 }
0x1967   :  { %v2010_v29 = vmul.f32 %v2008_v5, %v2003_v28 }
0x1969   :  { %v2012_v26 = vsel %vm2011_vm13, %v2010_v29, 0.0 }
0x196a   :  { %v2013_v55 = vrot.slane %v2012_v26, 4 }
0x196c   :  { %v2014_v60 = vadd.f32 %v2013_v55, %v2012_v26 }
0x196e   :  { %v2015_v15 = vrot.slane %v2014_v60, 2 }
0x1970   :  { %v2016_v10 = vadd.f32 %v2015_v15, %v2014_v60 }
0x1972   :  { %v2017_v7 = vrot.slane %v2016_v10, 1 }
0x1974   :  { %v2018_v21 = vadd.f32 %v2017_v7, %v2016_v10 }
0x197d   :  { %v2000_v8 = vpop.permute.xlu2 %1999 }
0x197e   :  { %v2004_v12 = vmul.f32 %v2000_v8, %v2977_v20  ;;  %v2142_v20 = vld [vmem:[#allocation2] ss:$0 sm:$0xff] }
0x1980   :  { %v2019_v14 = vmul.f32 %v2008_v5, %v2004_v12 }
0x1982   :  { %v2020_v6 = vsel %vm2011_vm13, %v2019_v14, 0.0 }
0x1983   :  { %v2021_v61 = vrot.slane %v2020_v6, 4 }
0x1985   :  { %v2022_v4 = vadd.f32 %v2021_v61, %v2020_v6 }
0x1987   :  { %v2023_v54 = vrot.slane %v2022_v4, 2 }
0x1989   :  { %v2024_v16 = vadd.f32 %v2023_v54, %v2022_v4 }
0x198b   :  { %v2025_v17 = vrot.slane %v2024_v16, 1 }
0x198d   :  { %v2026_v11 = vadd.f32 %v2025_v17, %v2024_v16 }
0x198f   :  { %v2027_v59 = vsel %vm1338_vm3, %v2018_v21, %v2026_v11 }
0x1990   :  { %2029 = vrot.lane.b32.xlu1 %v2027_v59, %s2518_s27 }
0x1a02   :  { %v2030_v35 = vpop.permute.xlu1 %2029 }
0x1a03   :  { %v2033_v13 = vsel %vm2032_vm0, %v2030_v35, 0.0 }
0x1a04   :  { %2034 = vadd.xlane.f32.xlu2 %v2033_v13 }
0x1a77   :  { %v2035_v1 = vpop.xlane.xlu2 %2034 }
0x1a78   :  { %v2040_v3 = vadd.f32 %v2142_v20, %v2035_v1 }
0x1a7a   :  { %2042 = vst.msk [vmem:[%s3116_s12] sm:$0x3] %vm2041_vm5, %v2040_v3 }
0x1a7b   :  { %2047 = vsyncpa [#allocation4], 1 }
0x1a7c   :  { %2048 = vsyncpa [#allocation6], 1 }
0x1a7d   :  { %2049 = vsyncpa [#allocation9], 1 }
0x1a7e   :  { %2050 = vsyncpa [#allocation12], 1 }
0x1a7f   :  { %2051 = vsyncpa [#allocation15], 1 }

</bundles_post_ra>
